<compile_context>
chip_gen: v7x
topology: tpu7x:2x2x1
jax: 0.10.0
libtpu: 0.0.40
codegen_flags: <defaults>
</compile_context>

<pallas_src>
import functools

import jax
import jax.numpy as jnp
from jax.experimental import pallas as pl
from jax.experimental.pallas import tpu as pltpu

EPS = 1e-5
LANE = 128


# ---------------------------------------------------------------------------
# Pallas kernel: (optional BN+ReLU) -> Linear -> (optional partial BN stats)
# ---------------------------------------------------------------------------
def _mlp_layer_kernel(*refs, apply_bn, emit_stats, tile_m, n_valid):
    idx = 0
    x_ref = refs[idx]; idx += 1
    if apply_bn:
        scale_ref, shift_ref = refs[idx], refs[idx + 1]; idx += 2
    w_ref, b_ref = refs[idx], refs[idx + 1]; idx += 2
    y_ref = refs[idx]; idx += 1
    if emit_stats:
        sum_ref, sq_ref = refs[idx], refs[idx + 1]

    h = x_ref[...]
    if apply_bn:
        # Folded BatchNorm (scale = gamma*rsqrt(var+eps), shift = beta-mean*scale)
        # followed by ReLU, applied with a single FMA per element in f32.
        h = jnp.maximum(h.astype(jnp.float32) * scale_ref[...] + shift_ref[...], 0.0)

    # bf16 operands on the MXU, f32 accumulation.
    y = jnp.dot(h.astype(jnp.bfloat16), w_ref[...],
                preferred_element_type=jnp.float32) + b_ref[...]
    yb = y.astype(y_ref.dtype)
    y_ref[...] = yb

    if emit_stats:
        # Partial BatchNorm statistics for this batch tile; padded rows masked.
        yf = yb.astype(jnp.float32)
        row = (jax.lax.broadcasted_iota(jnp.int32, (tile_m, 1), 0)
               + pl.program_id(0) * tile_m)
        valid = (row < n_valid).astype(jnp.float32)
        ym = yf * valid
        d = ym.shape[1]
        s = jnp.sum(ym, axis=0, keepdims=True)          # (1, D)
        sq = jnp.sum(ym * ym, axis=0, keepdims=True)    # (1, D)  single pass E[x^2]
        # Broadcast across 8 sublanes so the stats block is (8, D)-aligned.
        sum_ref[...] = jnp.broadcast_to(s, (8, d))
        sq_ref[...] = jnp.broadcast_to(sq, (8, d))


# ---------------------------------------------------------------------------
# Per-layer pallas_call wrapper
# ---------------------------------------------------------------------------
def mlp_layer(x, w, b, scale=None, shift=None, *, emit_stats, n_valid, tile_m,
              out_dtype):
    n_pad, in_dim = x.shape
    out_dim = w.shape[1]
    num_tiles = n_pad // tile_m
    apply_bn = scale is not None

    in_specs = [pl.BlockSpec((tile_m, in_dim), lambda i: (i, 0))]
    args = [x]
    if apply_bn:
        in_specs += [pl.BlockSpec((1, in_dim), lambda i: (0, 0)),
                     pl.BlockSpec((1, in_dim), lambda i: (0, 0))]
        args += [scale, shift]
    in_specs += [pl.BlockSpec((in_dim, out_dim), lambda i: (0, 0)),   # weights resident
                 pl.BlockSpec((1, out_dim), lambda i: (0, 0))]
    args += [w, b]

    out_shapes = [jax.ShapeDtypeStruct((n_pad, out_dim), out_dtype)]
    out_specs = [pl.BlockSpec((tile_m, out_dim), lambda i: (i, 0))]
    if emit_stats:
        out_shapes += [jax.ShapeDtypeStruct((num_tiles * 8, out_dim), jnp.float32)] * 2
        out_specs += [pl.BlockSpec((8, out_dim), lambda i: (i, 0))] * 2

    kern = functools.partial(_mlp_layer_kernel, apply_bn=apply_bn,
                             emit_stats=emit_stats, tile_m=tile_m, n_valid=n_valid)

    single = not emit_stats
    outs = pl.pallas_call(
        kern,
        grid=(num_tiles,),
        in_specs=in_specs,
        out_specs=out_specs[0] if single else tuple(out_specs),
        out_shape=out_shapes[0] if single else tuple(out_shapes),
        compiler_params=pltpu.CompilerParams(
            dimension_semantics=("parallel",)),   # row tiles independent -> 2 TCs on v7x
    )(*args)

    if emit_stats:
        y, psum, psq = outs
        s = psum.reshape(num_tiles, 8, out_dim)[:, 0, :].sum(axis=0)
        sq = psq.reshape(num_tiles, 8, out_dim)[:, 0, :].sum(axis=0)
        return y, s, sq
    return outs


# ---------------------------------------------------------------------------
# Full MLP forward (padded space).  Wp[i]: bf16 (Din_pad, Dout_pad),
# bp[i]: f32 (1, Dout_pad), gp/betap[i]: f32 (1, Dhid_pad) (padded with zeros).
# ---------------------------------------------------------------------------
def mlp_forward_pallas(x_pad, Wp, bp, gp, betap, *, n_valid, tile_m):
    num_layers = len(Wp)
    h = x_pad
    scale = shift = None
    for i in range(num_layers):
        last = (i == num_layers - 1)
        if last:
            return mlp_layer(h, Wp[i], bp[i], scale, shift,
                             emit_stats=False, n_valid=n_valid, tile_m=tile_m,
                             out_dtype=jnp.float32)
        y, s, sq = mlp_layer(h, Wp[i], bp[i], scale, shift,
                             emit_stats=True, n_valid=n_valid, tile_m=tile_m,
                             out_dtype=jnp.bfloat16)
        # Tiny (D,) batch-norm statistics reduce / fold (exact full-batch stats).
        mean = (s / n_valid)[None, :]
        var = jnp.maximum((sq / n_valid)[None, :] - mean * mean, 0.0)
        inv = gp[i] * jax.lax.rsqrt(var + EPS)     # gamma * rsqrt(var+eps)
        scale = inv
        shift = betap[i] - mean * inv
        h = y


# ---------------------------------------------------------------------------
# Helpers: padding + parameter init (mirrors nn.Linear uniform init bounds)
# ---------------------------------------------------------------------------
def _round_up(x, m):
    return (x + m - 1) // m * m


def _pad2(a, rows, cols):
    return jnp.pad(a, ((0, rows - a.shape[0]), (0, cols - a.shape[1])))


def init_mlp_params(key, num_layers, input_dim, hidden_dim, output_dim):
    dims = [input_dim] + [hidden_dim] * (num_layers - 1) + [output_dim]
    keys = jax.random.split(key, num_layers)
    Ws, bs, gammas, betas = [], [], [], []
    for i in range(num_layers):
        k1, k2, k3, k4 = jax.random.split(keys[i], 4)
        bound = 1.0 / (dims[i] ** 0.5)
        Ws.append(jax.random.uniform(k1, (dims[i], dims[i + 1]), jnp.float32,
                                     -bound, bound))
        bs.append(jax.random.uniform(k2, (dims[i + 1],), jnp.float32, -bound, bound))
        if i < num_layers - 1:
            gammas.append(jax.random.uniform(k3, (dims[i + 1],), jnp.float32, 0.5, 1.5))
            betas.append(0.1 * jax.random.normal(k4, (dims[i + 1],), jnp.float32))
    return dims, Ws, bs, gammas, betas


def pad_params(dims, Ws, bs, gammas, betas):
    dpad = [_round_up(d, LANE) for d in dims]
    Wp = [_pad2(Ws[i], dpad[i], dpad[i + 1]).astype(jnp.bfloat16)
          for i in range(len(Ws))]
    bp = [_pad2(bs[i][None, :], 1, dpad[i + 1]) for i in range(len(bs))]
    gp = [_pad2(gammas[i][None, :], 1, dpad[i + 1]) for i in range(len(gammas))]
    betap = [_pad2(betas[i][None, :], 1, dpad[i + 1]) for i in range(len(betas))]
    return dpad, Wp, bp, gp, betap


# ---------------------------------------------------------------------------
# Pure-JAX reference mirroring the kernel's bf16 GEMM / folded-BN numerics
# ---------------------------------------------------------------------------
def reference_forward(x, Ws, bs, gammas, betas):
    num_layers = len(Ws)
    h = x.astype(jnp.bfloat16)
    scale = shift = None
    for i in range(num_layers):
        if scale is not None:
            h = jnp.maximum(h.astype(jnp.float32) * scale + shift, 0.0)
            h = h.astype(jnp.bfloat16)
        y = jnp.dot(h, Ws[i].astype(jnp.bfloat16),
                    preferred_element_type=jnp.float32) + bs[i][None, :]
        if i == num_layers - 1:
            return y
        yb = y.astype(jnp.bfloat16)
        yf = yb.astype(jnp.float32)
        mean = yf.mean(axis=0, keepdims=True)
        var = jnp.maximum((yf * yf).mean(axis=0, keepdims=True) - mean * mean, 0.0)
        inv = gammas[i][None, :] * jax.lax.rsqrt(var + EPS)
        scale = inv
        shift = betas[i][None, :] - mean * inv
        h = yb


# ---------------------------------------------------------------------------
if __name__ == "__main__":
    key = jax.random.PRNGKey(0)
    k_x, k_p3, k_p1 = jax.random.split(key, 3)

    N = 200                    # batch (rows of x), deliberately not tile-aligned
    TILE_M = 128
    N_PAD = _round_up(N, TILE_M)

    x = jax.random.normal(k_x, (N, 64), jnp.float32)

    # --- case 1: num_layers = 3  (Linear -> BN -> ReLU -> Linear -> BN -> ReLU -> Linear)
    NUM_LAYERS, IN_DIM, HID_DIM, OUT_DIM = 3, 64, 96, 48
    dims, Ws, bs, gammas, betas = init_mlp_params(
        k_p3, NUM_LAYERS, IN_DIM, HID_DIM, OUT_DIM)
    dpad, Wp, bp, gp, betap = pad_params(dims, Ws, bs, gammas, betas)
    x_pad = _pad2(x, N_PAD, dpad[0]).astype(jnp.bfloat16)

    fwd3 = jax.jit(functools.partial(mlp_forward_pallas, n_valid=N, tile_m=TILE_M))
    out3 = fwd3(x_pad, Wp, bp, gp, betap)
    out3 = jax.block_until_ready(out3)[:N, :OUT_DIM]
    ref3 = reference_forward(x, Ws, bs, gammas, betas)
    assert out3.shape == (N, OUT_DIM)
    assert jnp.allclose(out3, ref3, atol=1e-2, rtol=1e-2), "3-layer MLP mismatch"

    # --- case 2: num_layers = 1  (pure Linear path of the module)
    dims1, Ws1, bs1, g1, b1 = init_mlp_params(k_p1, 1, IN_DIM, HID_DIM, OUT_DIM)
    dpad1, Wp1, bp1, gp1, betap1 = pad_params(dims1, Ws1, bs1, g1, b1)
    x_pad1 = _pad2(x, N_PAD, dpad1[0]).astype(jnp.bfloat16)

    fwd1 = jax.jit(functools.partial(mlp_forward_pallas, n_valid=N, tile_m=TILE_M))
    out1 = fwd1(x_pad1, Wp1, bp1, gp1, betap1)
    out1 = jax.block_until_ready(out1)[:N, :OUT_DIM]
    ref1 = reference_forward(x, Ws1, bs1, g1, b1)
    assert out1.shape == (N, OUT_DIM)
    assert jnp.allclose(out1, ref1, atol=1e-2, rtol=1e-2), "1-layer MLP mismatch"

    print("KERNEL_OK")
</pallas_src>

<mosaic_0001>
module attributes {stable_mosaic.version = 11 : i64} {
  func.func @_mlp_layer_kernel(%arg0: i32, %arg1: memref<128x128xbf16, #tpu.memory_space<vmem>>, %arg2: memref<128x128xbf16, #tpu.memory_space<vmem>>, %arg3: memref<1x128xf32, #tpu.memory_space<vmem>>, %arg4: memref<128x128xbf16, #tpu.memory_space<vmem>>, %arg5: memref<8x128xf32, #tpu.memory_space<vmem>>, %arg6: memref<8x128xf32, #tpu.memory_space<vmem>>) attributes {dimension_semantics = [#tpu.dimension_semantics<parallel>], iteration_bounds = array<i64: 2>, scalar_prefetch = 0 : i64, scratch_operands = 0 : i64, tpu.core_type = #tpu.core_type<tc>, window_params = [{transform_indices = @transform_0, window_bounds = array<i64: 128, 128>}, {pipeline_mode = #tpu.pipeline_mode<synchronous>, transform_indices = @transform_1, window_bounds = array<i64: 128, 128>}, {pipeline_mode = #tpu.pipeline_mode<synchronous>, transform_indices = @transform_2, window_bounds = array<i64: 1, 128>}, {transform_indices = @transform_3, window_bounds = array<i64: 128, 128>}, {transform_indices = @transform_4, window_bounds = array<i64: 8, 128>}, {transform_indices = @transform_5, window_bounds = array<i64: 8, 128>}]} {
    %c0 = arith.constant 0 : index
    %c0_0 = arith.constant 0 : index
    %0 = vector.load %arg1[%c0, %c0_0] : memref<128x128xbf16, #tpu.memory_space<vmem>>, vector<128x128xbf16>
    %c0_1 = arith.constant 0 : index
    %c0_2 = arith.constant 0 : index
    %1 = vector.load %arg2[%c0_1, %c0_2] : memref<128x128xbf16, #tpu.memory_space<vmem>>, vector<128x128xbf16>
    %cst = arith.constant dense<0.000000e+00> : vector<128x128xf32>
    %2 = tpu.matmul %0, %1, %cst {dimension_numbers = #tpu.dot_dimension_numbers<[1], [0], [0], [1], [0, 0, 1, 1], [], []>} : vector<128x128xbf16>, vector<128x128xbf16>, vector<128x128xf32> -> vector<128x128xf32>
    %c0_3 = arith.constant 0 : index
    %c0_4 = arith.constant 0 : index
    %3 = vector.load %arg3[%c0_3, %c0_4] : memref<1x128xf32, #tpu.memory_space<vmem>>, vector<1x128xf32>
    %4 = vector.broadcast %3 : vector<1x128xf32> to vector<128x128xf32>
    %5 = arith.addf %2, %4 : vector<128x128xf32>
    %6 = arith.truncf %5 : vector<128x128xf32> to vector<128x128xbf16>
    %c0_5 = arith.constant 0 : index
    %c0_6 = arith.constant 0 : index
    %7 = vector.load %arg4[%c0_5, %c0_6] : memref<128x128xbf16, #tpu.memory_space<vmem>>, vector<128x128xbf16>
    tpu.vector_store %arg4[%c0_5, %c0_6], %6 {strides = array<i32>} : memref<128x128xbf16, #tpu.memory_space<vmem>>, vector<128x128xbf16>,
    %8 = arith.extf %6 : vector<128x128xbf16> to vector<128x128xf32>
    %9 = tpu.iota {dimensions = array<i32: 0>} : vector<128x1xi32>
    %c128_i32 = arith.constant 128 : i32
    %10 = arith.muli %arg0, %c128_i32 : i32
    %11 = vector.broadcast %10 : i32 to vector<128x1xi32>
    %12 = arith.addi %9, %11 : vector<128x1xi32>
    %c200_i32 = arith.constant 200 : i32
    %13 = vector.broadcast %c200_i32 : i32 to vector<128x1xi32>
    %14 = arith.cmpi slt, %12, %13 : vector<128x1xi32>
    %15 = arith.extui %14 : vector<128x1xi1> to vector<128x1xi32>
    %16 = arith.sitofp %15 : vector<128x1xi32> to vector<128x1xf32>
    %17 = vector.broadcast %16 : vector<128x1xf32> to vector<128x128xf32>
    %18 = arith.mulf %8, %17 : vector<128x128xf32>
    %cst_7 = arith.constant dense<0.000000e+00> : vector<128xf32>
    %19 = vector.multi_reduction <add>, %18, %cst_7 [0] : vector<128x128xf32> to vector<128xf32>
    %20 = vector.shape_cast %19 : vector<128xf32> to vector<1x128xf32>
    %21 = arith.mulf %18, %18 : vector<128x128xf32>
    %cst_8 = arith.constant dense<0.000000e+00> : vector<128xf32>
    %22 = vector.multi_reduction <add>, %21, %cst_8 [0] : vector<128x128xf32> to vector<128xf32>
    %23 = vector.shape_cast %22 : vector<128xf32> to vector<1x128xf32>
    %24 = vector.shape_cast %20 : vector<1x128xf32> to vector<1x128xf32>
    %25 = vector.broadcast %24 : vector<1x128xf32> to vector<8x128xf32>
    %c0_9 = arith.constant 0 : index
    %c0_10 = arith.constant 0 : index
    %26 = vector.load %arg5[%c0_9, %c0_10] : memref<8x128xf32, #tpu.memory_space<vmem>>, vector<8x128xf32>
    tpu.vector_store %arg5[%c0_9, %c0_10], %25 {strides = array<i32>} : memref<8x128xf32, #tpu.memory_space<vmem>>, vector<8x128xf32>,
    %27 = vector.shape_cast %23 : vector<1x128xf32> to vector<1x128xf32>
    %28 = vector.broadcast %27 : vector<1x128xf32> to vector<8x128xf32>
    %c0_11 = arith.constant 0 : index
    %c0_12 = arith.constant 0 : index
    %29 = vector.load %arg6[%c0_11, %c0_12] : memref<8x128xf32, #tpu.memory_space<vmem>>, vector<8x128xf32>
    tpu.vector_store %arg6[%c0_11, %c0_12], %28 {strides = array<i32>} : memref<8x128xf32, #tpu.memory_space<vmem>>, vector<8x128xf32>,
    return
  }
  func.func @transform_0(%arg0: i32) -> (i32, i32) {
    %c0_i32 = arith.constant 0 : i32
    %c0_i32_0 = arith.constant 0 : i32
    return %arg0, %c0_i32 : i32, i32
  }
  func.func @transform_1(%arg0: i32) -> (i32, i32) {
    %c0_i32 = arith.constant 0 : i32
    %c0_i32_0 = arith.constant 0 : i32
    %c0_i32_1 = arith.constant 0 : i32
    return %c0_i32, %c0_i32_0 : i32, i32
  }
  func.func @transform_2(%arg0: i32) -> (i32, i32) {
    %c0_i32 = arith.constant 0 : i32
    %c0_i32_0 = arith.constant 0 : i32
    %c0_i32_1 = arith.constant 0 : i32
    return %c0_i32, %c0_i32_0 : i32, i32
  }
  func.func @transform_3(%arg0: i32) -> (i32, i32) {
    %c0_i32 = arith.constant 0 : i32
    %c0_i32_0 = arith.constant 0 : i32
    return %arg0, %c0_i32 : i32, i32
  }
  func.func @transform_4(%arg0: i32) -> (i32, i32) {
    %c0_i32 = arith.constant 0 : i32
    %c0_i32_0 = arith.constant 0 : i32
    return %arg0, %c0_i32 : i32, i32
  }
  func.func @transform_5(%arg0: i32) -> (i32, i32) {
    %c0_i32 = arith.constant 0 : i32
    %c0_i32_0 = arith.constant 0 : i32
    return %arg0, %c0_i32 : i32, i32
  }
}

module attributes {stable_mosaic.version = 11 : i64} {
  func.func @_mlp_layer_kernel(%arg0: i32, %arg1: memref<128x128xbf16, #tpu.memory_space<vmem>>, %arg2: memref<1x128xf32, #tpu.memory_space<vmem>>, %arg3: memref<1x128xf32, #tpu.memory_space<vmem>>, %arg4: memref<128x128xbf16, #tpu.memory_space<vmem>>, %arg5: memref<1x128xf32, #tpu.memory_space<vmem>>, %arg6: memref<128x128xbf16, #tpu.memory_space<vmem>>, %arg7: memref<8x128xf32, #tpu.memory_space<vmem>>, %arg8: memref<8x128xf32, #tpu.memory_space<vmem>>) attributes {dimension_semantics = [#tpu.dimension_semantics<parallel>], iteration_bounds = array<i64: 2>, scalar_prefetch = 0 : i64, scratch_operands = 0 : i64, tpu.core_type = #tpu.core_type<tc>, window_params = [{transform_indices = @transform_0, window_bounds = array<i64: 128, 128>}, {pipeline_mode = #tpu.pipeline_mode<synchronous>, transform_indices = @transform_1, window_bounds = array<i64: 1, 128>}, {pipeline_mode = #tpu.pipeline_mode<synchronous>, transform_indices = @transform_2, window_bounds = array<i64: 1, 128>}, {pipeline_mode = #tpu.pipeline_mode<synchronous>, transform_indices = @transform_3, window_bounds = array<i64: 128, 128>}, {pipeline_mode = #tpu.pipeline_mode<synchronous>, transform_indices = @transform_4, window_bounds = array<i64: 1, 128>}, {transform_indices = @transform_5, window_bounds = array<i64: 128, 128>}, {transform_indices = @transform_6, window_bounds = array<i64: 8, 128>}, {transform_indices = @transform_7, window_bounds = array<i64: 8, 128>}]} {
    %c0 = arith.constant 0 : index
    %c0_0 = arith.constant 0 : index
    %0 = vector.load %arg1[%c0, %c0_0] : memref<128x128xbf16, #tpu.memory_space<vmem>>, vector<128x128xbf16>
    %1 = arith.extf %0 : vector<128x128xbf16> to vector<128x128xf32>
    %c0_1 = arith.constant 0 : index
    %c0_2 = arith.constant 0 : index
    %2 = vector.load %arg2[%c0_1, %c0_2] : memref<1x128xf32, #tpu.memory_space<vmem>>, vector<1x128xf32>
    %3 = vector.broadcast %2 : vector<1x128xf32> to vector<128x128xf32>
    %4 = arith.mulf %1, %3 : vector<128x128xf32>
    %c0_3 = arith.constant 0 : index
    %c0_4 = arith.constant 0 : index
    %5 = vector.load %arg3[%c0_3, %c0_4] : memref<1x128xf32, #tpu.memory_space<vmem>>, vector<1x128xf32>
    %6 = vector.broadcast %5 : vector<1x128xf32> to vector<128x128xf32>
    %7 = arith.addf %4, %6 : vector<128x128xf32>
    %cst = arith.constant 0.000000e+00 : f32
    %8 = vector.broadcast %cst : f32 to vector<128x128xf32>
    %9 = arith.maximumf %7, %8 : vector<128x128xf32>
    %10 = arith.truncf %9 : vector<128x128xf32> to vector<128x128xbf16>
    %c0_5 = arith.constant 0 : index
    %c0_6 = arith.constant 0 : index
    %11 = vector.load %arg4[%c0_5, %c0_6] : memref<128x128xbf16, #tpu.memory_space<vmem>>, vector<128x128xbf16>
    %cst_7 = arith.constant dense<0.000000e+00> : vector<128x128xf32>
    %12 = tpu.matmul %10, %11, %cst_7 {dimension_numbers = #tpu.dot_dimension_numbers<[1], [0], [0], [1], [0, 0, 1, 1], [], []>} : vector<128x128xbf16>, vector<128x128xbf16>, vector<128x128xf32> -> vector<128x128xf32>
    %c0_8 = arith.constant 0 : index
    %c0_9 = arith.constant 0 : index
    %13 = vector.load %arg5[%c0_8, %c0_9] : memref<1x128xf32, #tpu.memory_space<vmem>>, vector<1x128xf32>
    %14 = vector.broadcast %13 : vector<1x128xf32> to vector<128x128xf32>
    %15 = arith.addf %12, %14 : vector<128x128xf32>
    %16 = arith.truncf %15 : vector<128x128xf32> to vector<128x128xbf16>
    %c0_10 = arith.constant 0 : index
    %c0_11 = arith.constant 0 : index
    %17 = vector.load %arg6[%c0_10, %c0_11] : memref<128x128xbf16, #tpu.memory_space<vmem>>, vector<128x128xbf16>
    tpu.vector_store %arg6[%c0_10, %c0_11], %16 {strides = array<i32>} : memref<128x128xbf16, #tpu.memory_space<vmem>>, vector<128x128xbf16>,
    %18 = arith.extf %16 : vector<128x128xbf16> to vector<128x128xf32>
    %19 = tpu.iota {dimensions = array<i32: 0>} : vector<128x1xi32>
    %c128_i32 = arith.constant 128 : i32
    %20 = arith.muli %arg0, %c128_i32 : i32
    %21 = vector.broadcast %20 : i32 to vector<128x1xi32>
    %22 = arith.addi %19, %21 : vector<128x1xi32>
    %c200_i32 = arith.constant 200 : i32
    %23 = vector.broadcast %c200_i32 : i32 to vector<128x1xi32>
    %24 = arith.cmpi slt, %22, %23 : vector<128x1xi32>
    %25 = arith.extui %24 : vector<128x1xi1> to vector<128x1xi32>
    %26 = arith.sitofp %25 : vector<128x1xi32> to vector<128x1xf32>
    %27 = vector.broadcast %26 : vector<128x1xf32> to vector<128x128xf32>
    %28 = arith.mulf %18, %27 : vector<128x128xf32>
    %cst_12 = arith.constant dense<0.000000e+00> : vector<128xf32>
    %29 = vector.multi_reduction <add>, %28, %cst_12 [0] : vector<128x128xf32> to vector<128xf32>
    %30 = vector.shape_cast %29 : vector<128xf32> to vector<1x128xf32>
    %31 = arith.mulf %28, %28 : vector<128x128xf32>
    %cst_13 = arith.constant dense<0.000000e+00> : vector<128xf32>
    %32 = vector.multi_reduction <add>, %31, %cst_13 [0] : vector<128x128xf32> to vector<128xf32>
    %33 = vector.shape_cast %32 : vector<128xf32> to vector<1x128xf32>
    %34 = vector.shape_cast %30 : vector<1x128xf32> to vector<1x128xf32>
    %35 = vector.broadcast %34 : vector<1x128xf32> to vector<8x128xf32>
    %c0_14 = arith.constant 0 : index
    %c0_15 = arith.constant 0 : index
    %36 = vector.load %arg7[%c0_14, %c0_15] : memref<8x128xf32, #tpu.memory_space<vmem>>, vector<8x128xf32>
    tpu.vector_store %arg7[%c0_14, %c0_15], %35 {strides = array<i32>} : memref<8x128xf32, #tpu.memory_space<vmem>>, vector<8x128xf32>,
    %37 = vector.shape_cast %33 : vector<1x128xf32> to vector<1x128xf32>
    %38 = vector.broadcast %37 : vector<1x128xf32> to vector<8x128xf32>
    %c0_16 = arith.constant 0 : index
    %c0_17 = arith.constant 0 : index
    %39 = vector.load %arg8[%c0_16, %c0_17] : memref<8x128xf32, #tpu.memory_space<vmem>>, vector<8x128xf32>
    tpu.vector_store %arg8[%c0_16, %c0_17], %38 {strides = array<i32>} : memref<8x128xf32, #tpu.memory_space<vmem>>, vector<8x128xf32>,
    return
  }
  func.func @transform_0(%arg0: i32) -> (i32, i32) {
    %c0_i32 = arith.constant 0 : i32
    %c0_i32_0 = arith.constant 0 : i32
    return %arg0, %c0_i32 : i32, i32
  }
  func.func @transform_1(%arg0: i32) -> (i32, i32) {
    %c0_i32 = arith.constant 0 : i32
    %c0_i32_0 = arith.constant 0 : i32
    %c0_i32_1 = arith.constant 0 : i32
    return %c0_i32, %c0_i32_0 : i32, i32
  }
  func.func @transform_2(%arg0: i32) -> (i32, i32) {
    %c0_i32 = arith.constant 0 : i32
    %c0_i32_0 = arith.constant 0 : i32
    %c0_i32_1 = arith.constant 0 : i32
    return %c0_i32, %c0_i32_0 : i32, i32
  }
  func.func @transform_3(%arg0: i32) -> (i32, i32) {
    %c0_i32 = arith.constant 0 : i32
    %c0_i32_0 = arith.constant 0 : i32
    %c0_i32_1 = arith.constant 0 : i32
    return %c0_i32, %c0_i32_0 : i32, i32
  }
  func.func @transform_4(%arg0: i32) -> (i32, i32) {
    %c0_i32 = arith.constant 0 : i32
    %c0_i32_0 = arith.constant 0 : i32
    %c0_i32_1 = arith.constant 0 : i32
    return %c0_i32, %c0_i32_0 : i32, i32
  }
  func.func @transform_5(%arg0: i32) -> (i32, i32) {
    %c0_i32 = arith.constant 0 : i32
    %c0_i32_0 = arith.constant 0 : i32
    return %arg0, %c0_i32 : i32, i32
  }
  func.func @transform_6(%arg0: i32) -> (i32, i32) {
    %c0_i32 = arith.constant 0 : i32
    %c0_i32_0 = arith.constant 0 : i32
    return %arg0, %c0_i32 : i32, i32
  }
  func.func @transform_7(%arg0: i32) -> (i32, i32) {
    %c0_i32 = arith.constant 0 : i32
    %c0_i32_0 = arith.constant 0 : i32
    return %arg0, %c0_i32 : i32, i32
  }
}

module attributes {stable_mosaic.version = 11 : i64} {
  func.func @_mlp_layer_kernel(%arg0: i32, %arg1: memref<128x128xbf16, #tpu.memory_space<vmem>>, %arg2: memref<1x128xf32, #tpu.memory_space<vmem>>, %arg3: memref<1x128xf32, #tpu.memory_space<vmem>>, %arg4: memref<128x128xbf16, #tpu.memory_space<vmem>>, %arg5: memref<1x128xf32, #tpu.memory_space<vmem>>, %arg6: memref<128x128xf32, #tpu.memory_space<vmem>>) attributes {dimension_semantics = [#tpu.dimension_semantics<parallel>], iteration_bounds = array<i64: 2>, scalar_prefetch = 0 : i64, scratch_operands = 0 : i64, tpu.core_type = #tpu.core_type<tc>, window_params = [{transform_indices = @transform_0, window_bounds = array<i64: 128, 128>}, {pipeline_mode = #tpu.pipeline_mode<synchronous>, transform_indices = @transform_1, window_bounds = array<i64: 1, 128>}, {pipeline_mode = #tpu.pipeline_mode<synchronous>, transform_indices = @transform_2, window_bounds = array<i64: 1, 128>}, {pipeline_mode = #tpu.pipeline_mode<synchronous>, transform_indices = @transform_3, window_bounds = array<i64: 128, 128>}, {pipeline_mode = #tpu.pipeline_mode<synchronous>, transform_indices = @transform_4, window_bounds = array<i64: 1, 128>}, {transform_indices = @transform_5, window_bounds = array<i64: 128, 128>}]} {
    %c0 = arith.constant 0 : index
    %c0_0 = arith.constant 0 : index
    %0 = vector.load %arg1[%c0, %c0_0] : memref<128x128xbf16, #tpu.memory_space<vmem>>, vector<128x128xbf16>
    %1 = arith.extf %0 : vector<128x128xbf16> to vector<128x128xf32>
    %c0_1 = arith.constant 0 : index
    %c0_2 = arith.constant 0 : index
    %2 = vector.load %arg2[%c0_1, %c0_2] : memref<1x128xf32, #tpu.memory_space<vmem>>, vector<1x128xf32>
    %3 = vector.broadcast %2 : vector<1x128xf32> to vector<128x128xf32>
    %4 = arith.mulf %1, %3 : vector<128x128xf32>
    %c0_3 = arith.constant 0 : index
    %c0_4 = arith.constant 0 : index
    %5 = vector.load %arg3[%c0_3, %c0_4] : memref<1x128xf32, #tpu.memory_space<vmem>>, vector<1x128xf32>
    %6 = vector.broadcast %5 : vector<1x128xf32> to vector<128x128xf32>
    %7 = arith.addf %4, %6 : vector<128x128xf32>
    %cst = arith.constant 0.000000e+00 : f32
    %8 = vector.broadcast %cst : f32 to vector<128x128xf32>
    %9 = arith.maximumf %7, %8 : vector<128x128xf32>
    %10 = arith.truncf %9 : vector<128x128xf32> to vector<128x128xbf16>
    %c0_5 = arith.constant 0 : index
    %c0_6 = arith.constant 0 : index
    %11 = vector.load %arg4[%c0_5, %c0_6] : memref<128x128xbf16, #tpu.memory_space<vmem>>, vector<128x128xbf16>
    %cst_7 = arith.constant dense<0.000000e+00> : vector<128x128xf32>
    %12 = tpu.matmul %10, %11, %cst_7 {dimension_numbers = #tpu.dot_dimension_numbers<[1], [0], [0], [1], [0, 0, 1, 1], [], []>} : vector<128x128xbf16>, vector<128x128xbf16>, vector<128x128xf32> -> vector<128x128xf32>
    %c0_8 = arith.constant 0 : index
    %c0_9 = arith.constant 0 : index
    %13 = vector.load %arg5[%c0_8, %c0_9] : memref<1x128xf32, #tpu.memory_space<vmem>>, vector<1x128xf32>
    %14 = vector.broadcast %13 : vector<1x128xf32> to vector<128x128xf32>
    %15 = arith.addf %12, %14 : vector<128x128xf32>
    %c0_10 = arith.constant 0 : index
    %c0_11 = arith.constant 0 : index
    %16 = vector.load %arg6[%c0_10, %c0_11] : memref<128x128xf32, #tpu.memory_space<vmem>>, vector<128x128xf32>
    tpu.vector_store %arg6[%c0_10, %c0_11], %15 {strides = array<i32>} : memref<128x128xf32, #tpu.memory_space<vmem>>, vector<128x128xf32>,
    return
  }
  func.func @transform_0(%arg0: i32) -> (i32, i32) {
    %c0_i32 = arith.constant 0 : i32
    %c0_i32_0 = arith.constant 0 : i32
    return %arg0, %c0_i32 : i32, i32
  }
  func.func @transform_1(%arg0: i32) -> (i32, i32) {
    %c0_i32 = arith.constant 0 : i32
    %c0_i32_0 = arith.constant 0 : i32
    %c0_i32_1 = arith.constant 0 : i32
    return %c0_i32, %c0_i32_0 : i32, i32
  }
  func.func @transform_2(%arg0: i32) -> (i32, i32) {
    %c0_i32 = arith.constant 0 : i32
    %c0_i32_0 = arith.constant 0 : i32
    %c0_i32_1 = arith.constant 0 : i32
    return %c0_i32, %c0_i32_0 : i32, i32
  }
  func.func @transform_3(%arg0: i32) -> (i32, i32) {
    %c0_i32 = arith.constant 0 : i32
    %c0_i32_0 = arith.constant 0 : i32
    %c0_i32_1 = arith.constant 0 : i32
    return %c0_i32, %c0_i32_0 : i32, i32
  }
  func.func @transform_4(%arg0: i32) -> (i32, i32) {
    %c0_i32 = arith.constant 0 : i32
    %c0_i32_0 = arith.constant 0 : i32
    %c0_i32_1 = arith.constant 0 : i32
    return %c0_i32, %c0_i32_0 : i32, i32
  }
  func.func @transform_5(%arg0: i32) -> (i32, i32) {
    %c0_i32 = arith.constant 0 : i32
    %c0_i32_0 = arith.constant 0 : i32
    return %arg0, %c0_i32 : i32, i32
  }
}

</mosaic_0001>

<bundles_post_ra>
// kernel: mlp_forward_pallas.3
= control target key start
LH: loop header
LB: loop body
LE: loop exit
PB: predicated region body
PF: predicated region fallthrough
CT: control target
= control target key end

     0   :  { %11 = vsyncpa [#allocation3], 0  ;;  %s1592_s0 = inlined_call_operand.hbm [shape: bf16[256,128], index: 0, kind: input, shape index: {}]   ;;  %s1593_s1 = inlined_call_operand.hbm [shape: bf16[128,128], index: 1, kind: input, shape index: {}]   ;;  %s1594_s2 = inlined_call_operand.vmem [shape: f32[1,128], index: 2, kind: input, shape index: {}]   ;;  %s1595_s3 = inlined_call_operand.vmem [shape: bf16[256,128], index: 3, kind: output, shape index: {0}]   ;;  %s1596_s4 = inlined_call_operand.vmem [shape: f32[16,128], index: 4, kind: output, shape index: {1}]   ;;  %s1597_s5 = inlined_call_operand.vmem [shape: f32[16,128], index: 5, kind: output, shape index: {2}]  }
   0x1   :  { %13 = vsyncpa [#allocation3 + $0x1], 0 }
   0x2   :  { %14 = vsyncpa [#allocation5], 0  ;;  %s1307_s18 = smov 0   ;;  %s1309_s19 = smov 0  }
   0x3   :  { %s1311_s20 = smov 0   ;;  %s1313_s21 = smov 0  }
   0x4 LB: > { %s1326_s22 = sadd.s32 4294967295, %s1270_s21   ;;  %p40_p0 = scmp.ne.s32.totalorder %s1262_s19, %s1258_s18  ;;  %s1270_s21 = sphi %s1313_s21, %s1613_s21   ;;  %s1266_s20 = sphi %s1311_s20, %s1612_s20   ;;  %s1262_s19 = sphi %s1309_s19, %s1611_s19   ;;  %s1258_s18 = sphi %s1307_s18, %s1610_s18  }
   0x5   : > { %p1598_p1 = scmp.eq.s32.totalorder %s1326_s22, 0  ;;  %p912_p2 = scmp.ge.s32.totalorder %s1270_s21, 1 }
   0x6   : > { %p171_p3 = scmp.lt.s32.totalorder %s1270_s21, 3  ;;  %s1272_s25 = smov [#allocation4]  }
   0x7   : > { %p1334_p4 = por %p1598_p1, %p40_p0  ;;  %s183_s26 = sshll.u32 %s1272_s25, 4  ;;  %s184_s26 = int_to_ptr.vmem [resolvable:$true] %s183_s26 }
   0x8   : > { %p1338_p5 = pnand %p912_p2, %p171_p3  ;;  %s1351_s28 = sadd.s32 1, %s1270_s21  }
   0x9   : > { %s1601_s23 = scalar_select %p1334_p4, 1, 0 }
   0xa   : > { %s1602_s24 = scalar_select %p1338_p5, 1, 0 }
   0xb   : > { %p1111_p6 = pneg %p1338_p5  ;;  %s27_s29 = sadd.s32 1, %s1266_s20 }
   0xc   : > { %s24_s30 = ssub.s32 %s1270_s21, %s1351_s28  ;;  %s1174_s8 = scalar_lea.hbm %s1593_s1, 1024 }
   0xd   : > { %p1346_p7 = pnand %p1111_p6, %p1598_p1  ;;  %p1175_p8 = scmp.ne.s32.totalorder %s1593_s1, %s1174_s8 }
   0xe   : > { %p1181_p12 = scmp.lt.u32.totalorder %s1174_s8, %s1593_s1 }
   0xf   : > { %p1176_p9 = pneg %p1346_p7 }
  0x11   : > { %p1177_p10 = pnand %p1176_p9, %p1175_p8 }
  0x13   : > { %p1178_p11 = pneg %p1177_p10 }
  0x15   : > { %p1183_p13 = pnand %p1181_p12, %p1178_p11 }
  0x17   : > { %1186 = shalt.err (!%p1183_p13)
}
  0x18   : > { %s1187_s13 = scalar_lea.vmem %s184_s26, 1024  ;;  %p1195_p6 = scmp.lt.s32.totalorder %s184_s26, %s184_s26 }
  0x19   : > { %p1188_p0 = scmp.ne.s32.totalorder %s184_s26, %s1187_s13  ;;  %p1196_p1 = scmp.lt.s32.totalorder %s1187_s13, %s1187_s13 }
  0x1b   : > { %p1190_p2 = pnand %p1188_p0, %p1176_p9  ;;  %p1197_p4 = por %p1196_p1, %p1195_p6 }
  0x1d   : > { %p1191_p3 = pneg %p1190_p2 }
  0x1f   : > { %p1198_p5 = pnand %p1197_p4, %p1191_p3 }
  0x21   : > { %1201 = shalt.err (!%p1198_p5)
}
  0x22   : > { %s1273_s14 = smov 64   ;;  %s1274_s15 = smov 4  }
  0x23   : > { %1114 = dma.hbm_to_vmem [thread:$0]  (!%p1346_p7), %s1593_s1, 1024, %s184_s26, [#allocation5], %s1273_s14, %s1273_s14, %s1274_s15  }
  0x24   : > { %p25_p1 = scmp.eq.s32.totalorder %s24_s30, 0  ;;  %p34_p4 = scmp.ne.s32.totalorder %s1266_s20, %s1262_s19 }
  0x25   : > { %p35_p5 = scmp.eq.s32.totalorder %s1270_s21, 0  ;;  %p1120_p8 = scmp.lt.s32.totalorder %s1270_s21, 2 }
  0x26   : > { %s1380_s18 = scalar_select %p25_p1, %s1266_s20, %s27_s29  }
  0x27   : > { %p36_p9 = por %p35_p5, %p34_p4  ;;  %s200_s25 = sand.u32 1, %s1266_s20  }
  0x28   : > { %s915_s6 = sshll.u32 %s200_s25, 6  ;;  %s977_s7 = sshll.u32 %s1270_s21, 10 }
  0x29   : > { %s1387_s27 = scalar_lea.hbm %s1592_s0, %s977_s7  ;;  %s204_s26 = scalar_lea.vmem [#allocation2], %s915_s6 }
  0x2a   : > { %s211_s30 = sshll.u32 %s204_s26, 4  ;;  %p1391_p7 = pnand %p1120_p8, %p36_p9  ;;  %s1389_s30 = int_to_ptr.vmem [resolvable:$true] %s211_s30 }
  0x2b   : > { %s1395_s21 = scalar_lea.sflag [#allocation3], %s200_s25  ;;  %s1202_s10 = scalar_lea.hbm %s1387_s27, 1024 }
  0x2c   : > { %p1203_p10 = scmp.ne.s32.totalorder %s1387_s27, %s1202_s10  ;;  %p1204_p11 = pneg %p1391_p7 }
  0x2d   : > { %s1207_s13 = scalar_lea.hbm %s1592_s0, 2048  ;;  %p1208_p0 = scmp.lt.u32.totalorder %s1387_s27, %s1592_s0 }
  0x2e   : > { %p1205_p12 = pnand %p1204_p11, %p1203_p10  ;;  %p1209_p2 = scmp.lt.u32.totalorder %s1207_s13, %s1202_s10 }
  0x2f   : > { %p1211_p6 = scmp.lt.u32.totalorder %s1202_s10, %s1387_s27 }
  0x30   : > { %p1206_p13 = pneg %p1205_p12  ;;  %p1210_p3 = por %p1209_p2, %p1208_p0 }
  0x32   : > { %p1212_p1 = por %p1211_p6, %p1210_p3 }
  0x34   : > { %p1213_p4 = pnand %p1212_p1, %p1206_p13 }
  0x36   : > { %1216 = shalt.err (!%p1213_p4)
}
  0x37   : > { %s1217_s25 = scalar_lea.vmem %s1389_s30, 1024  ;;  %s1275_s6 = smov [#allocation2]  }
  0x38   : > { %p1218_p5 = scmp.ne.s32.totalorder %s1389_s30, %s1217_s25  ;;  %s1222_s7 = sshll.u32 %s1275_s6, 4  ;;  %s1223_s7 = int_to_ptr.vmem [resolvable:$false] %s1222_s7 }
  0x39   : > { %s1224_s8 = scalar_lea.vmem %s1223_s7, 2048  ;;  %p1225_p10 = scmp.lt.s32.totalorder %s1389_s30, %s1223_s7 }
  0x3a   : > { %p1220_p8 = pnand %p1218_p5, %p1204_p11  ;;  %p1226_p12 = scmp.lt.s32.totalorder %s1224_s8, %s1217_s25 }
  0x3c   : > { %p1221_p9 = pneg %p1220_p8  ;;  %p1227_p0 = por %p1226_p12, %p1225_p10 }
  0x3e   : > { %p1228_p2 = pnand %p1227_p0, %p1221_p9 }
  0x40   : > { %1231 = shalt.err (!%p1228_p2)
}
  0x41   : > { %1118 = dma.hbm_to_vmem [thread:$0]  (!%p1391_p7), %s1387_s27, 1024, %s1389_s30, %s1395_s21, %s1273_s14, %s1273_s14, %s1274_s15  }
  0x42   : > { %p1605_p11 = scmp.ne.s32.totalorder %s1602_s24, 0 }
  0x43   : > { %s225_s9 = sand.u32 (!%p1605_p11), 1, %s1262_s19   ;;  %p1606_p13 = scmp.ne.s32.totalorder (!%p1605_p11), %s1601_s23, 0 }
  0x44   : > { %223 = sbr.rel (%p1605_p11) target bundleno = 382 (0x17e), region = 32  ;;  %s919_s26 = sshll.u32 (!%p1605_p11), %s225_s9, 6 }
  0x45   : > { %s226_s10 = scalar_lea.sflag (!%p1605_p11), [#allocation3], %s225_s9  ;;  %s1429_s11 = scalar_lea.vmem (!%p1605_p11), [#allocation2], %s919_s26 }
  0x4b   : > { %1249 = dma.done.wait (%p1606_p13), %s226_s10, 1024  }
  0x4c   : > { %1251 = vsyncadd (%p1606_p13), %s226_s10, 4294966272  ;;  %p1607_p3 = scmp.eq.s32.totalorder %s1326_s22, 0 }
  0x4e   : > { %1253 = dma.done.wait (%p1607_p3), [#allocation5], 1024   ;;  %p1608_p7 = pmov %p1607_p3 }
  0x4f   : > { %v1158_v0 = vld [vmem:[#allocation4] sm:$0xff]   ;;  %v1159_v1 = vld [vmem:[#allocation4 + $0x8] sm:$0xff]   ;;  %v1160_v2 = vld [vmem:[#allocation4 + $0x10] sm:$0xff]   ;;  %v612_v16 = vlaneseq  ;;  %s958_s23 = sshll.u32 %s1326_s22, 7  ;;  %s921_s24 = sshll.u32 %s1326_s22, 4  ;;  %v1276_v36 = vmov 0.0  }
  0x50   : > { %1255 = vsyncadd (%p1608_p7), [#allocation5], 4294966272  ;;  %1057 = vmatprep.subr.bf16.mxu0 %v1158_v0  ;;  %1089 = vmatprep.subr.bf16.mxu1 %v1158_v0  ;;  %v1161_v3 = vld [vmem:[#allocation4 + $0x18] sm:$0xff]   ;;  %v1166_v4 = vld [vmem:[%s1429_s11] sm:$0xff]   ;;  %v1453_v20 = vstv %s958_s23  ;;  %p270_p6 = scmp.lt.s32.totalorder %s921_s24, 31  ;;  %p275_p1 = scmp.lt.s32.totalorder %s1326_s22, 1 }
  0x51   : > { %1058 = vmatpush3.bf16.msra.mxu0 %v1158_v0  ;;  %1097 = vmatpush3.bf16.msra.mxu1 %v1158_v0  ;;  %v1162_v5 = vld [vmem:[#allocation4 + $0x20] sm:$0xff]   ;;  %v1163_v7 = vld [vmem:[#allocation4 + $0x28] sm:$0xff]   ;;  %v1164_v8 = vld [vmem:[#allocation4 + $0x30] sm:$0xff]   ;;  %v1447_v17 = vshrl.u32 %v612_v16, 7 }
  0x52   : > { %1059 = vmatprep.subr.bf16.mxu0 %v1159_v1  ;;  %1090 = vmatprep.subr.bf16.mxu1 %v1159_v1  ;;  %v1170_v6 = vld [vmem:[%s1429_s11 + $0x20] sm:$0xff]   ;;  %v1165_v9 = vld [vmem:[#allocation4 + $0x38] sm:$0xff]   ;;  %v1167_v10 = vld [vmem:[%s1429_s11 + $0x8] sm:$0xff]   ;;  %s1615_s24 = smov (!%p270_p6, %s921_s24), 31  ;;  %s1617_s22 = smov (!%p275_p1, %s1326_s22), 1 }
  0x53   : > { %1073 = vmatprep.mubr.bf16.mxu0 %v1166_v4  ;;  %1081 = vmatprep.mubr.bf16.mxu1 %v1170_v6  ;;  %v1171_v11 = vld [vmem:[%s1429_s11 + $0x28] sm:$0xff]   ;;  %v1168_v12 = vld [vmem:[%s1429_s11 + $0x10] sm:$0xff]   ;;  %v1169_v14 = vld [vmem:[%s1429_s11 + $0x18] sm:$0xff]   ;;  %v615_v18 = vadd.s32 16, %v1447_v17  ;;  %v616_v19 = vadd.s32 24, %v1447_v17  ;;  %v614_v21 = vadd.s32 8, %v1447_v17  ;;  %v631_v24 = vadd.s32 %v1453_v20, %v1447_v17 }
  0x54   : > { %v1172_v13 = vld [vmem:[%s1429_s11 + $0x30] sm:$0xff]   ;;  %v1173_v15 = vld [vmem:[%s1429_s11 + $0x38] sm:$0xff]   ;;  %v619_v25 = vadd.s32 48, %v1447_v17  ;;  %v620_v27 = vadd.s32 56, %v1447_v17  ;;  %v617_v28 = vadd.s32 32, %v1447_v17  ;;  %v618_v29 = vadd.s32 40, %v1447_v17 }
  0x55   : > { %1060 = vmatpush3.bf16.msra.mxu0 %v1159_v1  ;;  %1098 = vmatpush3.bf16.msra.mxu1 %v1159_v1  ;;  %v633_v22 = vadd.s32 %v1453_v20, %v615_v18  ;;  %v634_v23 = vadd.s32 %v1453_v20, %v616_v19  ;;  %v632_v26 = vadd.s32 %v1453_v20, %v614_v21  ;;  %vm647_vm2 = vcmp.lt.s32.totalorder %v631_v24, 200  ;;  %v1471_v32 = vld [vmem:[%s1594_s2] ss:$0 sm:$0xff]  ;;  %s922_s27 = sshll.u32 %s1615_s24, 2  ;;  %s923_s12 = sshll.u32 %s1617_s22, 3 }
  0x56   : > { %1061 = vmatprep.subr.bf16.mxu0 %v1160_v2  ;;  %1091 = vmatprep.subr.bf16.mxu1 %v1160_v2  ;;  %v637_v30 = vadd.s32 %v1453_v20, %v619_v25  ;;  %v638_v33 = vadd.s32 %v1453_v20, %v620_v27  ;;  %v959_v39 = vsel %vm647_vm2, 1.0, %v1276_v36  ;;  %v635_v43 = vadd.s32 %v1453_v20, %v617_v28  ;;  %s1490_s21 = scalar_lea.vmem %s1595_s3, %s922_s27  ;;  %s278_s17 = scalar_lea.vmem %s1596_s4, %s923_s12 }
  0x57   : > { %vm649_vm0 = vcmp.lt.s32.totalorder %v633_v22, 200  ;;  %vm650_vm1 = vcmp.lt.s32.totalorder %v634_v23, 200  ;;  %vm648_vm3 = vcmp.lt.s32.totalorder %v632_v26, 200  ;;  %v636_v44 = vadd.s32 %v1453_v20, %v618_v29  ;;  %s282_s7 = scalar_lea.vmem %s1597_s5, %s923_s12 }
  0x58   : > { %v961_v37 = vsel %vm649_vm0, 1.0, %v1276_v36  ;;  %v962_v38 = vsel %vm650_vm1, 1.0, %v1276_v36  ;;  %v623_v47 = vadd.s32 80, %v1447_v17  ;;  %vm653_vm4 = vcmp.lt.s32.totalorder %v637_v30, 200 }
  0x59   : > { %1062 = vmatpush3.bf16.msra.mxu0 %v1160_v2  ;;  %1099 = vmatpush3.bf16.msra.mxu1 %v1160_v2  ;;  %vm654_vm5 = vcmp.lt.s32.totalorder %v638_v33, 200  ;;  %v624_v58 = vadd.s32 88, %v1447_v17  ;;  %v621_v59 = vadd.s32 64, %v1447_v17  ;;  %vm651_vm6 = vcmp.lt.s32.totalorder %v635_v43, 200 }
  0x5a   : > { %1063 = vmatprep.subr.bf16.mxu0 %v1161_v3  ;;  %1092 = vmatprep.subr.bf16.mxu1 %v1161_v3  ;;  %v641_v61 = vadd.s32 %v1453_v20, %v623_v47  ;;  %v960_v1 = vsel %vm648_vm3, 1.0, %v1276_v36  ;;  %v1506_v2 = vsel %vm653_vm4, 1.0, %v1276_v36  ;;  %v1513_v6 = vsel %vm654_vm5, 1.0, %v1276_v36 }
  0x5b   : > { %vm652_vm7 = vcmp.lt.s32.totalorder %v636_v44, 200 }
  0x5c   : > { %vm657_vm8 = vcmp.lt.s32.totalorder %v641_v61, 200  ;;  %v964_v33 = vsel %vm652_vm7, 1.0, %v1276_v36 }
  0x5d   : > { %1064 = vmatpush3.bf16.msra.mxu0 %v1161_v3  ;;  %1100 = vmatpush3.bf16.msra.mxu1 %v1161_v3 }
  0x5e   : > { %1065 = vmatprep.subr.bf16.mxu0 %v1162_v5  ;;  %1093 = vmatprep.subr.bf16.mxu1 %v1162_v5 }
  0x61   : > { %1066 = vmatpush3.bf16.msra.mxu0 %v1162_v5  ;;  %1101 = vmatpush3.bf16.msra.mxu1 %v1162_v5 }
  0x62   : > { %1067 = vmatprep.subr.bf16.mxu0 %v1163_v7  ;;  %1094 = vmatprep.subr.bf16.mxu1 %v1163_v7 }
  0x65   : > { %1068 = vmatpush3.bf16.msra.mxu0 %v1163_v7  ;;  %1102 = vmatpush3.bf16.msra.mxu1 %v1163_v7 }
  0x66   : > { %1069 = vmatprep.subr.bf16.mxu0 %v1164_v8  ;;  %1095 = vmatprep.subr.bf16.mxu1 %v1164_v8 }
  0x69   : > { %1070 = vmatpush3.bf16.msra.mxu0 %v1164_v8  ;;  %1103 = vmatpush3.bf16.msra.mxu1 %v1164_v8 }
  0x6a   : > { %1071 = vmatprep.subr.bf16.mxu0 %v1165_v9  ;;  %1096 = vmatprep.subr.bf16.mxu1 %v1165_v9 }
  0x6d   : > { %1072 = vmatpush3.bf16.msra.mxu0 %v1165_v9  ;;  %1104 = vmatpush3.bf16.msra.mxu1 %v1165_v9  ;;  %v963_v9 = vsel %vm651_vm6, 1.0, %v1276_v36 }
  0x70   : > { %1074 = vmatmul.mubr.bf16.vlgmr.msra.gmra.mrb[0].mxu0 %v1167_v10  ;;  %1082 = vmatmul.mubr.bf16.vlgmr.msra.gmra.mrb[0].mxu1 %v1171_v11  ;;  %v1520_v10 = vadd.s32 %v1453_v20, %v624_v58  ;;  %v622_v11 = vadd.s32 72, %v1447_v17 }
  0x71   : > { %1077 = vmatprep.mubr.bf16.mxu0 %v1168_v12  ;;  %1085 = vmatprep.mubr.bf16.mxu1 %v1172_v13  ;;  %v639_v12 = vadd.s32 %v1453_v20, %v621_v59  ;;  %v626_v59 = vadd.s32 104, %v1447_v17 }
  0x72   : > { %vm658_vm9 = vcmp.lt.s32.totalorder %v1520_v10, 200 }
  0x73   : > { %vm655_vm10 = vcmp.lt.s32.totalorder %v639_v12, 200  ;;  %v644_v12 = vadd.s32 %v1453_v20, %v626_v59 }
  0x75   : > { %vm660_vm13 = vcmp.lt.s32.totalorder %v644_v12, 200 }
  0x78   : > { %1078 = vmatmul.mubr.bf16.gmra.mrb[4].mxu0 %v1169_v14  ;;  %1086 = vmatmul.mubr.bf16.gmra.mrb[4].mxu1 %v1173_v15 }
 0x143   : > { %v1075_v31 = vpop.f32.mrb[0].mxu0  ;;  %v1083_v34 = vpop.f32.mrb[0].mxu1 }
 0x144   : > { %v453_v35 = vpop.f32.mrb[1].mxu0  ;;  %v494_v40 = vadd.f32 %v1083_v34, %v1471_v32  ;;  %v485_v41 = vpop.f32.mrb[1].mxu1  ;;  %v462_v48 = vadd.f32 %v1075_v31, %v1471_v32  ;;  %v969_v34 = vsel %vm657_vm8, 1.0, %v1276_v36 }
 0x145   : > { %v1076_v42 = vpop.f32.mrb[2].mxu0  ;;  %v486_v45 = vadd.f32 %v1471_v32, %v485_v41  ;;  %v1084_v46 = vpop.f32.mrb[2].mxu1  ;;  %v454_v53 = vadd.f32 %v1471_v32, %v453_v35  ;;  %v640_v35 = vadd.s32 %v1453_v20, %v622_v11  ;;  %v628_v11 = vadd.s32 120, %v1447_v17 }
 0x146   : > { %v465_v49 = vadd.f32 %v1076_v42, %v1471_v32  ;;  %v456_v50 = vpop.f32.mrb[3].mxu0  ;;  %v497_v51 = vadd.f32 %v1084_v46, %v1471_v32  ;;  %v488_v52 = vpop.f32.mrb[3].mxu1 }
 0x147   : > { %v457_v54 = vadd.f32 %v1471_v32, %v456_v50  ;;  %v489_v55 = vadd.f32 %v1471_v32, %v488_v52  ;;  %vm656_vm11 = vcmp.lt.s32.totalorder %v640_v35, 200 }
 0x148   : > { %v517_v56 = vpack.c.bf16 %v465_v49, %v462_v48  ;;  %v1494_v57 = vpack.c.bf16 %v497_v51, %v494_v40  ;;  %v625_v51 = vadd.s32 96, %v1447_v17 }
 0x149   : > { %v516_v60 = vpack.c.bf16 %v457_v54, %v454_v53  ;;  %v1499_v62 = vpack.c.bf16 %v489_v55, %v486_v45 }
 0x14a   : > { %1034 = vst [vmem:[%s1490_s21 + $0x8] sm:$0xff] %v517_v56   ;;  %v598_v63 = vunpack.c.l.bf16 %v517_v56  ;;  %v599_v0 = vunpack.c.h.bf16 %v517_v56  ;;  %1038 = vst [vmem:[%s1490_s21 + $0x28] sm:$0xff] %v1494_v57  }
 0x14b   : > { %998 = vst [vmem:[%s1490_s21] sm:$0xff] %v516_v60   ;;  %v596_v3 = vunpack.c.l.bf16 %v516_v60  ;;  %v597_v4 = vunpack.c.h.bf16 %v516_v60  ;;  %v1079_v5 = vpop.f32.mrb[4].mxu0  ;;  %1037 = vst [vmem:[%s1490_s21 + $0x20] sm:$0xff] %v1499_v62   ;;  %v1087_v7 = vpop.f32.mrb[4].mxu1  ;;  %v604_v56 = vunpack.c.l.bf16 %v1499_v62 }
 0x14c   : > { %v469_v8 = vpop.f32.mrb[5].mxu0  ;;  %v501_v13 = vpop.f32.mrb[5].mxu1  ;;  %v697_v14 = vmul.f32 %v961_v37, %v598_v63  ;;  %v698_v21 = vmul.f32 %v962_v38, %v599_v0  ;;  %v478_v22 = vadd.f32 %v1079_v5, %v1471_v32  ;;  %v510_v43 = vadd.f32 %v1087_v7, %v1471_v32 }
 0x14d   : > { %v695_v15 = vmul.f32 %v959_v39, %v596_v3  ;;  %v696_v16 = vmul.f32 %v960_v1, %v597_v4  ;;  %v1080_v18 = vpop.f32.mrb[6].mxu0  ;;  %v1088_v19 = vpop.f32.mrb[6].mxu1  ;;  %v470_v23 = vadd.f32 %v1471_v32, %v469_v8  ;;  %v502_v49 = vadd.f32 %v1471_v32, %v501_v13 }
 0x14e   : > { %v481_v24 = vadd.f32 %v1080_v18, %v1471_v32  ;;  %v472_v25 = vpop.f32.mrb[7].mxu0  ;;  %v504_v26 = vpop.f32.mrb[7].mxu1  ;;  %v734_v37 = vmul.f32 %v697_v14, %v697_v14  ;;  %v735_v41 = vmul.f32 %v698_v21, %v698_v21  ;;  %v513_v50 = vadd.f32 %v1088_v19, %v1471_v32 }
 0x14f   : > { %v711_v27 = vadd.f32 %v696_v16, %v695_v15  ;;  %v732_v28 = vmul.f32 %v695_v15, %v695_v15  ;;  %v733_v29 = vmul.f32 %v696_v16, %v696_v16  ;;  %v473_v30 = vadd.f32 %v1471_v32, %v472_v25 }
 0x150   : > { %v519_v31 = vpack.c.bf16 %v481_v24, %v478_v22  ;;  %v505_v55 = vadd.f32 %v1471_v32, %v504_v26  ;;  %v1541_v58 = vpack.c.bf16 %v513_v50, %v510_v43  ;;  %v605_v1 = vunpack.c.h.bf16 %v1499_v62 }
 0x151   : > { %v712_v38 = vadd.f32 %v711_v27, %v697_v14  ;;  %v748_v39 = vadd.f32 %v733_v29, %v732_v28  ;;  %v518_v40 = vpack.c.bf16 %v473_v30, %v470_v23  ;;  %v967_v3 = vsel %vm655_vm10, 1.0, %v1276_v36 }
 0x152   : > { %1036 = vst [vmem:[%s1490_s21 + $0x18] sm:$0xff] %v519_v31   ;;  %v602_v42 = vunpack.c.l.bf16 %v519_v31  ;;  %v603_v48 = vunpack.c.h.bf16 %v519_v31  ;;  %v522_v0 = vpack.c.bf16 %v505_v55, %v502_v49  ;;  %1040 = vst [vmem:[%s1490_s21 + $0x38] sm:$0xff] %v1541_v58   ;;  %v627_v32 = vadd.s32 112, %v1447_v17 }
 0x153   : > { %v749_v45 = vadd.f32 %v748_v39, %v734_v37  ;;  %1035 = vst [vmem:[%s1490_s21 + $0x10] sm:$0xff] %v518_v40   ;;  %v600_v44 = vunpack.c.l.bf16 %v518_v40  ;;  %v601_v46 = vunpack.c.h.bf16 %v518_v40  ;;  %v713_v47 = vadd.f32 %v712_v38, %v698_v21 }
 0x154   : > { %v701_v60 = vmul.f32 %v1506_v2, %v602_v42  ;;  %v643_v4 = vadd.s32 %v1453_v20, %v625_v51  ;;  %v702_v5 = vmul.f32 %v1513_v6, %v603_v48  ;;  %1039 = vst [vmem:[%s1490_s21 + $0x30] sm:$0xff] %v522_v0   ;;  %v606_v2 = vunpack.c.l.bf16 %v1494_v57 }
 0x155   : > { %v699_v52 = vmul.f32 %v963_v9, %v600_v44  ;;  %v700_v53 = vmul.f32 %v964_v33, %v601_v46  ;;  %v750_v54 = vadd.f32 %v749_v45, %v735_v41  ;;  %v968_v62 = vsel %vm656_vm11, 1.0, %v1276_v36 }
 0x156   : > { %v738_v13 = vmul.f32 %v701_v60, %v701_v60  ;;  %v703_v16 = vmul.f32 %v967_v3, %v604_v56  ;;  %v607_v18 = vunpack.c.h.bf16 %v1494_v57  ;;  %v970_v6 = vsel %vm658_vm9, 1.0, %v1276_v36 }
 0x157   : > { %v714_v61 = vadd.f32 %v713_v47, %v699_v52  ;;  %v736_v63 = vmul.f32 %v699_v52, %v699_v52  ;;  %v737_v8 = vmul.f32 %v700_v53, %v700_v53  ;;  %v645_v19 = vadd.s32 %v1453_v20, %v627_v32 }
 0x158   : > { %vm659_vm12 = vcmp.lt.s32.totalorder %v643_v4, 200  ;;  %v739_v21 = vmul.f32 %v702_v5, %v702_v5  ;;  %v704_v23 = vmul.f32 %v968_v62, %v605_v1  ;;  %v705_v17 = vmul.f32 %v969_v34, %v606_v2 }
 0x159   : > { %v715_v7 = vadd.f32 %v714_v61, %v700_v53  ;;  %v751_v9 = vadd.f32 %v750_v54, %v736_v63  ;;  %v646_v25 = vadd.s32 %v1453_v20, %v628_v11  ;;  %v740_v27 = vmul.f32 %v703_v16, %v703_v16 }
 0x15a   : > { %v608_v29 = vunpack.c.l.bf16 %v522_v0  ;;  %v706_v57 = vmul.f32 %v970_v6, %v607_v18  ;;  %vm661_vm14 = vcmp.lt.s32.totalorder %v645_v19, 200  ;;  %v971_v10 = vsel %vm659_vm12, 1.0, %v1276_v36 }
 0x15b   : > { %v716_v14 = vadd.f32 %v715_v7, %v701_v60  ;;  %v752_v15 = vadd.f32 %v751_v9, %v737_v8  ;;  %v741_v31 = vmul.f32 %v704_v23, %v704_v23  ;;  %v609_v35 = vunpack.c.h.bf16 %v522_v0 }
 0x15c   : > { %v742_v37 = vmul.f32 %v705_v17, %v705_v17  ;;  %vm662_vm15 = vcmp.lt.s32.totalorder %v646_v25, 200  ;;  %v972_v38 = vsel %vm660_vm13, 1.0, %v1276_v36  ;;  %v610_v20 = vunpack.c.l.bf16 %v1541_v58 }
 0x15d   : > { %v753_v22 = vadd.f32 %v752_v15, %v738_v13  ;;  %v717_v24 = vadd.f32 %v716_v14, %v702_v5  ;;  %v707_v40 = vmul.f32 %v971_v10, %v608_v29  ;;  %v743_v41 = vmul.f32 %v706_v57, %v706_v57 }
 0x15e   : > { %v973_v42 = vsel %vm661_vm14, 1.0, %v1276_v36  ;;  %v611_v45 = vunpack.c.h.bf16 %v1541_v58  ;;  %v708_v44 = vmul.f32 %v972_v38, %v609_v35  ;;  %v974_v47 = vsel %vm662_vm15, 1.0, %v1276_v36 }
 0x15f   : > { %v718_v26 = vadd.f32 %v717_v24, %v703_v16  ;;  %v754_v28 = vadd.f32 %v753_v22, %v739_v21  ;;  %v709_v48 = vmul.f32 %v973_v42, %v610_v20  ;;  %v744_v50 = vmul.f32 %v707_v40, %v707_v40 }
 0x160   : > { %v710_v52 = vmul.f32 %v974_v47, %v611_v45  ;;  %v745_v54 = vmul.f32 %v708_v44, %v708_v44 }
 0x161   : > { %v719_v30 = vadd.f32 %v718_v26, %v704_v23  ;;  %v755_v33 = vadd.f32 %v754_v28, %v740_v27  ;;  %v746_v56 = vmul.f32 %v709_v48, %v709_v48 }
 0x162   : > { %v747_v61 = vmul.f32 %v710_v52, %v710_v52 }
 0x163   : > { %v720_v34 = vadd.f32 %v719_v30, %v705_v17  ;;  %v756_v39 = vadd.f32 %v755_v33, %v741_v31 }
 0x165   : > { %v757_v43 = vadd.f32 %v756_v39, %v742_v37  ;;  %v721_v46 = vadd.f32 %v720_v34, %v706_v57 }
 0x167   : > { %v722_v49 = vadd.f32 %v721_v46, %v707_v40  ;;  %v758_v51 = vadd.f32 %v757_v43, %v743_v41 }
 0x169   : > { %v723_v53 = vadd.f32 %v722_v49, %v708_v44  ;;  %v759_v55 = vadd.f32 %v758_v51, %v744_v50 }
 0x16b   : > { %v724_v59 = vadd.f32 %v723_v53, %v709_v48  ;;  %v760_v60 = vadd.f32 %v759_v55, %v745_v54 }
 0x16d   : > { %v725_v58 = vadd.f32 %v724_v59, %v710_v52  ;;  %v761_v63 = vadd.f32 %v760_v60, %v746_v56 }
 0x16f   : > { %v726_v0 = vrot.slane %v725_v58, 4  ;;  %v762_v1 = vadd.f32 %v761_v63, %v747_v61 }
 0x171   : > { %v727_v36 = vadd.f32 %v726_v0, %v725_v58  ;;  %v763_v3 = vrot.slane %v762_v1, 4 }
 0x173   : > { %v728_v32 = vrot.slane %v727_v36, 2  ;;  %v764_v4 = vadd.f32 %v763_v3, %v762_v1 }
 0x175   : > { %v729_v5 = vadd.f32 %v728_v32, %v727_v36  ;;  %v765_v7 = vrot.slane %v764_v4, 2 }
 0x177   : > { %v730_v8 = vrot.slane %v729_v5, 1  ;;  %v766_v9 = vadd.f32 %v765_v7, %v764_v4 }
 0x179   : > { %v731_v2 = vadd.f32 %v730_v8, %v729_v5  ;;  %v767_v62 = vrot.slane %v766_v9, 1 }
 0x17b   : > { %v768_v11 = vadd.f32 %v767_v62, %v766_v9  ;;  %769 = vst [vmem:[%s278_s17] sm:$0xff] %v731_v2 }
 0x17d   : > { %770 = vst [vmem:[%s282_s7] sm:$0xff] %v768_v11 }
 0x17e PF: > { %s1609_s22 = smov %s1380_s18  ;;  %p17_p4 = scmp.ge.s32.totalorder %s1351_s28, 4  }
 0x17f   : > { %s1610_s18 = smov %s1262_s19  ;;  %s1611_s19 = smov %s1266_s20 }
 0x180   : > { %s1612_s20 = smov %s1609_s22  ;;  %s1613_s21 = smov %s1351_s28 }
 0x181   :  { %19 = sbr.rel (!%p17_p4) target bundleno = 4 (0x4), region = 100 }
 0x188   :  { %821 = vsyncpa [#allocation3], 1 }
 0x189   :  { %823 = vsyncpa [#allocation3 + $0x1], 1 }
 0x18a   :  { %824 = vsyncpa [#allocation5], 1 }

// kernel: mlp_forward_pallas.5
= control target key start
LH: loop header
LB: loop body
LE: loop exit
PB: predicated region body
PF: predicated region fallthrough
CT: control target
= control target key end

     0   :  { %10 = vsyncpa [#allocation3], 0  ;;  %s1066_s0 = inlined_call_operand.vmem [shape: bf16[256,128], index: 0, kind: input, shape index: {}]   ;;  %s1067_s1 = inlined_call_operand.vmem [shape: f32[1,128], index: 1, kind: input, shape index: {}]   ;;  %s1068_s2 = inlined_call_operand.vmem [shape: f32[1,128], index: 2, kind: input, shape index: {}]   ;;  %s1069_s3 = inlined_call_operand.vmem [shape: bf16[128,128], index: 3, kind: input, shape index: {}]   ;;  %s1070_s4 = inlined_call_operand.vmem [shape: f32[1,128], index: 4, kind: input, shape index: {}]   ;;  %s1071_s5 = inlined_call_operand.hbm [shape: f32[256,128], index: 5, kind: output, shape index: {}]  }
   0x1   :  { %12 = vsyncpa [#allocation3 + $0x1], 0  ;;  %s862_s18 = smov 0   ;;  %s864_s19 = smov 0  }
   0x2   :  { %s866_s20 = smov 0   ;;  %s868_s21 = smov 0  }
   0x3 LB: > { %s883_s22 = sadd.s32 4294967295, %s827_s21   ;;  %s589_s23 = sadd.s32 4294967294, %s827_s21   ;;  %s827_s21 = sphi %s868_s21, %s1077_s21   ;;  %s823_s20 = sphi %s866_s20, %s1076_s20   ;;  %s819_s19 = sphi %s864_s19, %s1075_s19   ;;  %s815_s18 = sphi %s862_s18, %s1074_s18  }
   0x4   : > { %s887_s24 = sadd.s32 1, %s827_s21   ;;  %s135_s25 = sadd.s32 1, %s823_s20 }
   0x5   : > { %s132_s26 = ssub.s32 %s827_s21, %s887_s24  ;;  %p145_p0 = scmp.ne.s32.totalorder %s823_s20, %s819_s19 }
   0x6   : > { %p133_p1 = scmp.eq.s32.totalorder %s132_s26, 0  ;;  %p146_p2 = scmp.eq.s32.totalorder %s883_s22, 1 }
   0x7   : > { %p151_p3 = scmp.ne.s32.totalorder %s819_s19, %s815_s18  ;;  %p152_p4 = scmp.eq.s32.totalorder %s589_s23, 1 }
   0x8   : > { %s898_s27 = scalar_select %p133_p1, %s823_s20, %s135_s25  }
   0x9   : > { %p900_p5 = por %p146_p2, %p145_p0  ;;  %p904_p6 = por %p152_p4, %p151_p3 }
   0xa   : > { %p592_p7 = scmp.ge.s32.totalorder %s827_s21, 1  ;;  %p191_p8 = scmp.lt.s32.totalorder %s827_s21, 3 }
   0xc   : > { %p192_p9 = pnand %p592_p7, %p191_p8 }
   0xd   : > { %v757_v0 = vld [vmem:[%s1069_s3] sm:$0xff] (!%p192_p9)   ;;  %s594_s7 = sshll.u32 (!%p192_p9), %s883_s22, 4  ;;  %v758_v1 = vld [vmem:[%s1069_s3 + $0x8] sm:$0xff] (!%p192_p9)   ;;  %v759_v2 = vld [vmem:[%s1069_s3 + $0x10] sm:$0xff] (!%p192_p9)   ;;  %s216_s14 = sand.u32 (!%p192_p9), 1, %s819_s19  }
   0xe   : > { %195 = sbr.rel (%p192_p9) target bundleno = 287 (0x11f), region = 40  ;;  %p220_p10 = scmp.lt.s32.totalorder (!%p192_p9), %s594_s7, 31  ;;  %668 = vmatprep.subr.bf16.mxu0 (!%p192_p9), %v757_v0  ;;  %700 = vmatprep.subr.bf16.mxu1 (!%p192_p9), %v757_v0  ;;  %v760_v3 = vld [vmem:[%s1069_s3 + $0x18] sm:$0xff] (!%p192_p9)   ;;  %v932_v5 = vld [vmem:[%s1067_s1] ss:$0 sm:$0xff] (!%p192_p9)  ;;  %v762_v32 = vld [vmem:[%s1069_s3 + $0x28] sm:$0xff] (!%p192_p9)  }
   0xf   : > { %669 = vmatpush3.bf16.msra.mxu0 (!%p192_p9), %v757_v0  ;;  %708 = vmatpush3.bf16.msra.mxu1 (!%p192_p9), %v757_v0  ;;  %v939_v10 = vld [vmem:[%s1068_s2] ss:$0 sm:$0xff] (!%p192_p9)  ;;  %v763_v48 = vld [vmem:[%s1069_s3 + $0x30] sm:$0xff] (!%p192_p9)   ;;  %v764_v63 = vld [vmem:[%s1069_s3 + $0x38] sm:$0xff] (!%p192_p9)   ;;  %s612_s25 = sshll.u32 (!%p192_p9), %s883_s22, 11  ;;  %s829_s9 = smov (!%p192_p9), [#allocation2]  }
  0x10   : > { %670 = vmatprep.subr.bf16.mxu0 (!%p192_p9), %v758_v1  ;;  %701 = vmatprep.subr.bf16.mxu1 (!%p192_p9), %v758_v1  ;;  %v761_v17 = vld [vmem:[%s1069_s3 + $0x20] sm:$0xff] (!%p192_p9)   ;;  %s1013_s6 = scalar_lea.hbm (!%p192_p9), %s1071_s5, %s612_s25  ;;  %s769_s10 = sshll.u32 (!%p192_p9), %s829_s9, 4  ;;  %s770_s10 = int_to_ptr.vmem [resolvable:$false] %s769_s10 }
  0x11   : > { %s771_s11 = scalar_lea.vmem (!%p192_p9), %s770_s10, 4096 }
  0x13   : > { %671 = vmatpush3.bf16.msra.mxu0 (!%p192_p9), %v758_v1  ;;  %709 = vmatpush3.bf16.msra.mxu1 (!%p192_p9), %v758_v1 }
  0x14   : > { %672 = vmatprep.subr.bf16.mxu0 (!%p192_p9), %v759_v2  ;;  %702 = vmatprep.subr.bf16.mxu1 (!%p192_p9), %v759_v2 }
  0x15   : > { %s1079_s7 = smov (!%p220_p10, %s594_s7), 31 }
  0x16   : > { %s595_s12 = sshll.u32 %s1079_s7, 2  ;;  %s1025_s7 = scalar_lea.sflag [#allocation3], %s216_s14 }
  0x17   : > { %s923_s15 = scalar_lea.vmem %s1066_s0, %s595_s12  ;;  %673 = vmatpush3.bf16.msra.mxu0 %v759_v2  ;;  %710 = vmatpush3.bf16.msra.mxu1 %v759_v2 }
  0x18   : > { %v614_v4 = vld [vmem:[%s923_s15] sm:$0xff]   ;;  %v645_v9 = vld [vmem:[%s923_s15 + $0x8] sm:$0xff]   ;;  %v646_v16 = vld [vmem:[%s923_s15 + $0x10] sm:$0xff]   ;;  %674 = vmatprep.subr.bf16.mxu0 %v760_v3  ;;  %703 = vmatprep.subr.bf16.mxu1 %v760_v3 }
  0x19   : > { %v615_v6 = vunpack.c.l.bf16 %v614_v4  ;;  %v616_v7 = vunpack.c.h.bf16 %v614_v4  ;;  %v648_v8 = vld [vmem:[%s923_s15 + $0x20] sm:$0xff]   ;;  %v649_v13 = vld [vmem:[%s923_s15 + $0x28] sm:$0xff]   ;;  %v619_v20 = vunpack.c.l.bf16 %v645_v9  ;;  %v620_v21 = vunpack.c.h.bf16 %v645_v9  ;;  %v650_v31 = vld [vmem:[%s923_s15 + $0x30] sm:$0xff]  }
  0x1a   : > { %v631_v11 = vunpack.c.l.bf16 %v648_v8  ;;  %v632_v12 = vunpack.c.h.bf16 %v648_v8  ;;  %v635_v24 = vunpack.c.l.bf16 %v649_v13  ;;  %v636_v25 = vunpack.c.h.bf16 %v649_v13  ;;  %v647_v44 = vld [vmem:[%s923_s15 + $0x18] sm:$0xff]  }
  0x1b   : > { %v266_v14 = vmul.f32 %v615_v6, %v932_v5  ;;  %v267_v15 = vmul.f32 %v616_v7, %v932_v5  ;;  %v623_v28 = vunpack.c.l.bf16 %v646_v16  ;;  %675 = vmatpush3.bf16.msra.mxu0 %v760_v3  ;;  %711 = vmatpush3.bf16.msra.mxu1 %v760_v3  ;;  %v268_v35 = vmul.f32 %v619_v20, %v932_v5  ;;  %v651_v47 = vld [vmem:[%s923_s15 + $0x38] sm:$0xff]   ;;  %s593_s15 = sshll.u32 %s216_s14, 7 }
  0x1c   : > { %v274_v18 = vmul.f32 %v631_v11, %v932_v5  ;;  %v275_v19 = vmul.f32 %v632_v12, %v932_v5  ;;  %676 = vmatprep.subr.bf16.mxu0 %v761_v17  ;;  %704 = vmatprep.subr.bf16.mxu1 %v761_v17  ;;  %v269_v36 = vmul.f32 %v620_v21, %v932_v5  ;;  %v624_v40 = vunpack.c.h.bf16 %v646_v16  ;;  %s996_s23 = scalar_lea.vmem [#allocation2], %s593_s15 }
  0x1d   : > { %v289_v22 = vadd.f32 %v939_v10, %v266_v14  ;;  %v290_v23 = vadd.f32 %v939_v10, %v267_v15  ;;  %v276_v38 = vmul.f32 %v635_v24, %v932_v5  ;;  %v277_v39 = vmul.f32 %v636_v25, %v932_v5  ;;  %s527_s26 = sshll.u32 %s996_s23, 4  ;;  %s1015_s26 = int_to_ptr.vmem [resolvable:$true] %s527_s26 }
  0x1e   : > { %v297_v26 = vadd.f32 %v939_v10, %v274_v18  ;;  %v298_v27 = vadd.f32 %v939_v10, %v275_v19  ;;  %v270_v42 = vmul.f32 %v623_v28, %v932_v5  ;;  %v639_v43 = vunpack.c.l.bf16 %v650_v31  ;;  %s765_s8 = scalar_lea.vmem %s1015_s26, 2048  ;;  %p772_p0 = scmp.lt.s32.totalorder %s1015_s26, %s770_s10 }
  0x1f   : > { %v305_v29 = vmax.f32 %v289_v22, 0.0  ;;  %v306_v30 = vmax.f32 %v290_v23, 0.0  ;;  %677 = vmatpush3.bf16.msra.mxu0 %v761_v17  ;;  %712 = vmatpush3.bf16.msra.mxu1 %v761_v17  ;;  %v271_v45 = vmul.f32 %v624_v40, %v932_v5  ;;  %v640_v46 = vunpack.c.h.bf16 %v650_v31  ;;  %p766_p11 = scmp.ne.s32.totalorder %s1015_s26, %s765_s8  ;;  %p773_p1 = scmp.lt.s32.totalorder %s771_s11, %s765_s8 }
  0x20   : > { %v313_v33 = vmax.f32 %v297_v26, 0.0  ;;  %v314_v34 = vmax.f32 %v298_v27, 0.0  ;;  %678 = vmatprep.subr.bf16.mxu0 %v762_v32  ;;  %705 = vmatprep.subr.bf16.mxu1 %v762_v32  ;;  %v291_v49 = vadd.f32 %v939_v10, %v268_v35  ;;  %v292_v50 = vadd.f32 %v939_v10, %v269_v36 }
  0x21   : > { %v321_v37 = vpack.c.bf16 %v306_v30, %v305_v29  ;;  %v278_v51 = vmul.f32 %v639_v43, %v932_v5  ;;  %v299_v52 = vadd.f32 %v939_v10, %v276_v38  ;;  %v300_v53 = vadd.f32 %v939_v10, %v277_v39  ;;  %p767_p12 = pnand %p766_p11, %p900_p5  ;;  %p774_p2 = por %p773_p1, %p772_p0 }
  0x22   : > { %v325_v41 = vpack.c.bf16 %v314_v34, %v313_v33  ;;  %v279_v54 = vmul.f32 %v640_v46, %v932_v5  ;;  %v627_v55 = vunpack.c.l.bf16 %v647_v44  ;;  %v293_v56 = vadd.f32 %v939_v10, %v270_v42 }
  0x23   : > { %684 = vmatprep.mubr.bf16.mxu0 %v321_v37  ;;  %v628_v57 = vunpack.c.h.bf16 %v647_v44  ;;  %v643_v58 = vunpack.c.l.bf16 %v651_v47  ;;  %v644_v59 = vunpack.c.h.bf16 %v651_v47  ;;  %679 = vmatpush3.bf16.msra.mxu0 %v762_v32  ;;  %v294_v60 = vadd.f32 %v939_v10, %v271_v45  ;;  %p768_p13 = pneg %p767_p12 }
  0x24   : > { %692 = vmatprep.mubr.bf16.mxu1 %v325_v41  ;;  %713 = vmatpush3.bf16.msra.mxu1 %v762_v32  ;;  %v301_v61 = vadd.f32 %v939_v10, %v278_v51  ;;  %v302_v62 = vadd.f32 %v939_v10, %v279_v54  ;;  %v307_v0 = vmax.f32 %v291_v49, 0.0  ;;  %v308_v1 = vmax.f32 %v292_v50, 0.0 }
  0x25   : > { %680 = vmatprep.subr.bf16.mxu0 %v763_v48  ;;  %706 = vmatprep.subr.bf16.mxu1 %v763_v48  ;;  %v315_v2 = vmax.f32 %v299_v52, 0.0  ;;  %v316_v3 = vmax.f32 %v300_v53, 0.0  ;;  %v272_v4 = vmul.f32 %v627_v55, %v932_v5  ;;  %v273_v6 = vmul.f32 %v628_v57, %v932_v5  ;;  %p775_p3 = pnand %p774_p2, %p768_p13 }
  0x26   : > { %v280_v7 = vmul.f32 %v643_v58, %v932_v5  ;;  %v281_v8 = vmul.f32 %v644_v59, %v932_v5  ;;  %v309_v9 = vmax.f32 %v293_v56, 0.0  ;;  %v310_v11 = vmax.f32 %v294_v60, 0.0 }
  0x27   : > { %681 = vmatpush3.bf16.msra.mxu0 %v763_v48  ;;  %v317_v12 = vmax.f32 %v301_v61, 0.0  ;;  %v318_v13 = vmax.f32 %v302_v62, 0.0  ;;  %v322_v14 = vpack.c.bf16 %v308_v1, %v307_v0  ;;  %v326_v15 = vpack.c.bf16 %v316_v3, %v315_v2 }
  0x28   : > { %714 = vmatpush3.bf16.msra.mxu1 %v763_v48  ;;  %682 = vmatprep.subr.bf16.mxu0 %v764_v63  ;;  %v295_v16 = vadd.f32 %v939_v10, %v272_v4  ;;  %v296_v17 = vadd.f32 %v939_v10, %v273_v6  ;;  %v303_v18 = vadd.f32 %v939_v10, %v280_v7 }
  0x29   : > { %707 = vmatprep.subr.bf16.mxu1 %v764_v63  ;;  %v304_v19 = vadd.f32 %v939_v10, %v281_v8  ;;  %v323_v5 = vpack.c.bf16 %v310_v11, %v309_v9  ;;  %v327_v20 = vpack.c.bf16 %v318_v13, %v317_v12  ;;  %v598_v10 = vld [vmem:[%s1070_s4] ss:$0 sm:$0xff] }
  0x2a   : > { %v311_v21 = vmax.f32 %v295_v16, 0.0  ;;  %v312_v22 = vmax.f32 %v296_v17, 0.0  ;;  %v319_v23 = vmax.f32 %v303_v18, 0.0 }
  0x2b   : > { %683 = vmatpush3.bf16.msra.mxu0 %v764_v63  ;;  %v320_v24 = vmax.f32 %v304_v19, 0.0 }
  0x2c   : > { %715 = vmatpush3.bf16.msra.mxu1 %v764_v63  ;;  %v324_v25 = vpack.c.bf16 %v312_v22, %v311_v21 }
  0x2d   : > { %v328_v26 = vpack.c.bf16 %v320_v24, %v319_v23 }
  0x2e   : > { %685 = vmatmul.mubr.bf16.vlgmr.msra.gmra.mrb[0].mxu0 %v322_v14 }
  0x2f   : > { %693 = vmatmul.mubr.bf16.vlgmr.msra.gmra.mrb[0].mxu1 %v326_v15  ;;  %688 = vmatprep.mubr.bf16.mxu0 %v323_v5 }
  0x30   : > { %696 = vmatprep.mubr.bf16.mxu1 %v327_v20 }
  0x36   : > { %689 = vmatmul.mubr.bf16.gmra.mrb[4].mxu0 %v324_v25 }
  0x37   : > { %697 = vmatmul.mubr.bf16.gmra.mrb[4].mxu1 %v328_v26 }
 0x101   : > { %v686_v27 = vpop.f32.mrb[0].mxu0 }
 0x102   : > { %v694_v28 = vpop.f32.mrb[0].mxu1  ;;  %v443_v29 = vadd.f32 %v686_v27, %v598_v10  ;;  %v434_v31 = vpop.f32.mrb[1].mxu0 }
 0x103   : > { %v475_v30 = vadd.f32 %v694_v28, %v598_v10  ;;  %v466_v32 = vpop.f32.mrb[1].mxu1  ;;  %v435_v33 = vadd.f32 %v598_v10, %v434_v31  ;;  %v687_v35 = vpop.f32.mrb[2].mxu0 }
 0x104   : > { %v467_v34 = vadd.f32 %v598_v10, %v466_v32  ;;  %v695_v36 = vpop.f32.mrb[2].mxu1  ;;  %499 = vst [vmem:[%s996_s23 + $0x10] sm:$0xff] %v443_v29  ;;  %v446_v37 = vadd.f32 %v687_v35, %v598_v10  ;;  %v437_v39 = vpop.f32.mrb[3].mxu0 }
 0x105   : > { %507 = vst [vmem:[%s996_s23 + $0x50] sm:$0xff] %v475_v30  ;;  %v478_v38 = vadd.f32 %v695_v36, %v598_v10  ;;  %v469_v40 = vpop.f32.mrb[3].mxu1  ;;  %497 = vst [vmem:[%s996_s23] sm:$0xff] %v435_v33  ;;  %v438_v41 = vadd.f32 %v598_v10, %v437_v39 }
 0x106   : > { %505 = vst [vmem:[%s996_s23 + $0x40] sm:$0xff] %v467_v34  ;;  %v470_v42 = vadd.f32 %v598_v10, %v469_v40  ;;  %500 = vst [vmem:[%s996_s23 + $0x18] sm:$0xff] %v446_v37 }
 0x107   : > { %508 = vst [vmem:[%s996_s23 + $0x58] sm:$0xff] %v478_v38  ;;  %498 = vst [vmem:[%s996_s23 + $0x8] sm:$0xff] %v438_v41 }
 0x108   : > { %506 = vst [vmem:[%s996_s23 + $0x48] sm:$0xff] %v470_v42 }
 0x109   : > { %v690_v43 = vpop.f32.mrb[4].mxu0 }
 0x10a   : > { %v698_v44 = vpop.f32.mrb[4].mxu1  ;;  %v459_v45 = vadd.f32 %v690_v43, %v598_v10  ;;  %v450_v47 = vpop.f32.mrb[5].mxu0 }
 0x10b   : > { %v491_v46 = vadd.f32 %v698_v44, %v598_v10  ;;  %v482_v48 = vpop.f32.mrb[5].mxu1  ;;  %v451_v49 = vadd.f32 %v598_v10, %v450_v47  ;;  %v691_v51 = vpop.f32.mrb[6].mxu0 }
 0x10c   : > { %v483_v50 = vadd.f32 %v598_v10, %v482_v48  ;;  %v699_v52 = vpop.f32.mrb[6].mxu1  ;;  %503 = vst [vmem:[%s996_s23 + $0x30] sm:$0xff] %v459_v45  ;;  %v462_v53 = vadd.f32 %v691_v51, %v598_v10  ;;  %v453_v55 = vpop.f32.mrb[7].mxu0 }
 0x10d   : > { %511 = vst [vmem:[%s996_s23 + $0x70] sm:$0xff] %v491_v46  ;;  %v494_v54 = vadd.f32 %v699_v52, %v598_v10  ;;  %v485_v56 = vpop.f32.mrb[7].mxu1  ;;  %501 = vst [vmem:[%s996_s23 + $0x20] sm:$0xff] %v451_v49  ;;  %v454_v57 = vadd.f32 %v598_v10, %v453_v55 }
 0x10e   : > { %509 = vst [vmem:[%s996_s23 + $0x60] sm:$0xff] %v483_v50  ;;  %v486_v58 = vadd.f32 %v598_v10, %v485_v56  ;;  %504 = vst [vmem:[%s996_s23 + $0x38] sm:$0xff] %v462_v53 }
 0x10f   : > { %512 = vst [vmem:[%s996_s23 + $0x78] sm:$0xff] %v494_v54  ;;  %502 = vst [vmem:[%s996_s23 + $0x28] sm:$0xff] %v454_v57 }
 0x110   : > { %510 = vst [vmem:[%s996_s23 + $0x68] sm:$0xff] %v486_v58 }
 0x111   : > { %778 = shalt.err (!%p775_p3)
}
 0x112   : > { %s779_s12 = scalar_lea.hbm %s1013_s6, 2048  ;;  %s783_s15 = scalar_lea.hbm %s1071_s5, 4096 }
 0x113   : > { %p780_p4 = scmp.ne.s32.totalorder %s1013_s6, %s779_s12  ;;  %p784_p9 = scmp.lt.u32.totalorder %s1013_s6, %s1071_s5 }
 0x114   : > { %p785_p10 = scmp.lt.u32.totalorder %s783_s15, %s779_s12  ;;  %p787_p12 = scmp.lt.u32.totalorder %s779_s12, %s1013_s6 }
 0x115   : > { %p781_p7 = pnand %p780_p4, %p900_p5 }
 0x116   : > { %p786_p11 = por %p785_p10, %p784_p9 }
 0x117   : > { %p782_p8 = pneg %p781_p7 }
 0x118   : > { %p788_p13 = por %p787_p12, %p786_p11 }
 0x11a   : > { %p789_p0 = pnand %p788_p13, %p782_p8 }
 0x11c   : > { %792 = shalt.err (!%p789_p0)
}
 0x11d   : > { %s830_s23 = smov 128   ;;  %s831_s25 = smov 8  }
 0x11e   : > { %716 = dma.vmem_to_hbm [thread:$0]  (%p900_p5), %s1015_s26, 2048, %s1013_s6, %s1025_s7, %s830_s23, %s830_s23, %s831_s25  }
 0x11f PF: > { %p722_p1 = scmp.ge.s32.totalorder %s827_s21, 2  ;;  %s542_s22 = sand.u32 1, %s815_s18  }
 0x120   : > { %s543_s30 = scalar_lea.sflag [#allocation3], %s542_s22 }
 0x121   : > { %p719_p2 = pnand %p722_p1, %p904_p6 }
 0x123   : > { %810 = dma.done.wait (!%p719_p2), %s543_s30, 2048  }
 0x124   : > { %812 = vsyncadd (!%p719_p2), %s543_s30, 4294965248  ;;  %p15_p3 = scmp.ge.s32.totalorder %s887_s24, 4   ;;  %s1074_s18 = smov %s819_s19 }
 0x125   : > { %s1075_s19 = smov %s823_s20  ;;  %s1076_s20 = smov %s898_s27 }
 0x126   : > { %s1077_s21 = smov %s887_s24  ;;  %17 = sbr.rel (!%p15_p3) target bundleno = 3 (0x3), region = 75 }
 0x12d   :  { %548 = vsyncpa [#allocation3], 1 }
 0x12e   :  { %550 = vsyncpa [#allocation3 + $0x1], 1 }

// kernel: mlp_forward_pallas.4
= control target key start
LH: loop header
LB: loop body
LE: loop exit
PB: predicated region body
PF: predicated region fallthrough
CT: control target
= control target key end

     0   :  { %s1236_s24 = smov 0   ;;  %s1464_s0 = inlined_call_operand.vmem [shape: bf16[256,128], index: 0, kind: input, shape index: {}]   ;;  %s1465_s1 = inlined_call_operand.vmem [shape: f32[1,128], index: 1, kind: input, shape index: {}]   ;;  %s1466_s2 = inlined_call_operand.vmem [shape: f32[1,128], index: 2, kind: input, shape index: {}]   ;;  %s1467_s3 = inlined_call_operand.vmem [shape: bf16[128,128], index: 3, kind: input, shape index: {}]   ;;  %s1468_s4 = inlined_call_operand.vmem [shape: f32[1,128], index: 4, kind: input, shape index: {}]   ;;  %s1469_s5 = inlined_call_operand.vmem [shape: bf16[256,128], index: 5, kind: output, shape index: {0}]   ;;  %s1470_s6 = inlined_call_operand.vmem [shape: f32[16,128], index: 6, kind: output, shape index: {1}]   ;;  %s1471_s7 = inlined_call_operand.vmem [shape: f32[16,128], index: 7, kind: output, shape index: {2}]  }
   0x1 LB: > { %s1242_s25 = sadd.s32 4294967295, %s1193_s24   ;;  %p951_p0 = scmp.ge.s32.totalorder %s1193_s24, 1  ;;  %s1193_s24 = sphi %s1236_s24, %s18_s24  }
   0x2   : > { %p243_p1 = scmp.lt.s32.totalorder %s1193_s24, 3 }
   0x4   : > { %p244_p2 = pnand %p951_p0, %p243_p1 }
   0x5   : > { %v1179_v0 = vld [vmem:[%s1467_s3] sm:$0xff] (!%p244_p2)   ;;  %s952_s28 = sshll.u32 (!%p244_p2), %s1242_s25, 4  ;;  %v1180_v1 = vld [vmem:[%s1467_s3 + $0x8] sm:$0xff] (!%p244_p2)   ;;  %v1181_v2 = vld [vmem:[%s1467_s3 + $0x10] sm:$0xff] (!%p244_p2)   ;;  %s985_s8 = sshll.u32 (!%p244_p2), %s1242_s25, 7 }
   0x6   : > { %247 = sbr.rel (%p244_p2) target bundleno = 308 (0x134), region = 40  ;;  %p284_p3 = scmp.lt.s32.totalorder (!%p244_p2), %s952_s28, 31  ;;  %1122 = vmatprep.subr.bf16.mxu0 (!%p244_p2), %v1179_v0  ;;  %1154 = vmatprep.subr.bf16.mxu1 (!%p244_p2), %v1179_v0  ;;  %v1182_v3 = vld [vmem:[%s1467_s3 + $0x18] sm:$0xff] (!%p244_p2)   ;;  %v1273_v5 = vld [vmem:[%s1465_s1] ss:$0 sm:$0xff] (!%p244_p2)  ;;  %v1184_v28 = vld [vmem:[%s1467_s3 + $0x28] sm:$0xff] (!%p244_p2)  }
   0x7   : > { %1123 = vmatpush3.bf16.msra.mxu0 (!%p244_p2), %v1179_v0  ;;  %1162 = vmatpush3.bf16.msra.mxu1 (!%p244_p2), %v1179_v0  ;;  %v1280_v10 = vld [vmem:[%s1466_s2] ss:$0 sm:$0xff] (!%p244_p2)  ;;  %v1185_v44 = vld [vmem:[%s1467_s3 + $0x30] sm:$0xff] (!%p244_p2)   ;;  %v1186_v61 = vld [vmem:[%s1467_s3 + $0x38] sm:$0xff] (!%p244_p2)   ;;  %p295_p4 = scmp.lt.s32.totalorder (!%p244_p2), %s1242_s25, 1 }
   0x8   : > { %1124 = vmatprep.subr.bf16.mxu0 (!%p244_p2), %v1180_v1  ;;  %1155 = vmatprep.subr.bf16.mxu1 (!%p244_p2), %v1180_v1  ;;  %v1183_v16 = vld [vmem:[%s1467_s3 + $0x20] sm:$0xff] (!%p244_p2)  }
   0xb   : > { %1125 = vmatpush3.bf16.msra.mxu0 (!%p244_p2), %v1180_v1  ;;  %1163 = vmatpush3.bf16.msra.mxu1 (!%p244_p2), %v1180_v1 }
   0xc   : > { %1126 = vmatprep.subr.bf16.mxu0 (!%p244_p2), %v1181_v2  ;;  %1156 = vmatprep.subr.bf16.mxu1 (!%p244_p2), %v1181_v2 }
   0xd   : > { %s1473_s28 = smov (!%p284_p3, %s952_s28), 31  ;;  %s1475_s25 = smov (!%p295_p4, %s1242_s25), 1 }
   0xe   : > { %s953_s10 = sshll.u32 %s1473_s28, 2  ;;  %s956_s28 = sshll.u32 %s1475_s25, 3 }
   0xf   : > { %s1264_s13 = scalar_lea.vmem %s1464_s0, %s953_s10  ;;  %1127 = vmatpush3.bf16.msra.mxu0 %v1181_v2  ;;  %1164 = vmatpush3.bf16.msra.mxu1 %v1181_v2  ;;  %s1372_s14 = scalar_lea.vmem %s1469_s5, %s953_s10 }
  0x10   : > { %v1021_v4 = vld [vmem:[%s1264_s13] sm:$0xff]   ;;  %v1092_v8 = vld [vmem:[%s1264_s13 + $0x8] sm:$0xff]   ;;  %v1093_v9 = vld [vmem:[%s1264_s13 + $0x10] sm:$0xff]   ;;  %1128 = vmatprep.subr.bf16.mxu0 %v1182_v3  ;;  %1157 = vmatprep.subr.bf16.mxu1 %v1182_v3  ;;  %s298_s16 = scalar_lea.vmem %s1470_s6, %s956_s28  ;;  %s302_s19 = scalar_lea.vmem %s1471_s7, %s956_s28 }
  0x11   : > { %v1022_v6 = vunpack.c.l.bf16 %v1021_v4  ;;  %v1023_v7 = vunpack.c.h.bf16 %v1021_v4  ;;  %v1026_v11 = vunpack.c.l.bf16 %v1092_v8  ;;  %v1027_v14 = vunpack.c.h.bf16 %v1092_v8  ;;  %v1095_v15 = vld [vmem:[%s1264_s13 + $0x20] sm:$0xff]   ;;  %v1094_v22 = vld [vmem:[%s1264_s13 + $0x18] sm:$0xff]   ;;  %v1096_v27 = vld [vmem:[%s1264_s13 + $0x28] sm:$0xff]  }
  0x12   : > { %v1030_v17 = vunpack.c.l.bf16 %v1093_v9  ;;  %v1031_v21 = vunpack.c.h.bf16 %v1093_v9  ;;  %v1038_v23 = vunpack.c.l.bf16 %v1095_v15  ;;  %v1097_v30 = vld [vmem:[%s1264_s13 + $0x30] sm:$0xff]   ;;  %v1034_v32 = vunpack.c.l.bf16 %v1094_v22  ;;  %v1098_v39 = vld [vmem:[%s1264_s13 + $0x38] sm:$0xff]  }
  0x13   : > { %v343_v12 = vmul.f32 %v1022_v6, %v1273_v5  ;;  %v344_v13 = vmul.f32 %v1023_v7, %v1273_v5  ;;  %v345_v20 = vmul.f32 %v1026_v11, %v1273_v5  ;;  %1129 = vmatpush3.bf16.msra.mxu0 %v1182_v3  ;;  %1165 = vmatpush3.bf16.msra.mxu1 %v1182_v3  ;;  %v1035_v33 = vunpack.c.h.bf16 %v1094_v22 }
  0x14   : > { %v346_v26 = vmul.f32 %v1027_v14, %v1273_v5  ;;  %1130 = vmatprep.subr.bf16.mxu0 %v1183_v16  ;;  %1158 = vmatprep.subr.bf16.mxu1 %v1183_v16  ;;  %v347_v29 = vmul.f32 %v1030_v17, %v1273_v5  ;;  %v1039_v34 = vunpack.c.h.bf16 %v1095_v15  ;;  %v348_v36 = vmul.f32 %v1031_v21, %v1273_v5 }
  0x15   : > { %v366_v18 = vadd.f32 %v1280_v10, %v343_v12  ;;  %v367_v19 = vadd.f32 %v1280_v10, %v344_v13  ;;  %v368_v35 = vadd.f32 %v1280_v10, %v345_v20  ;;  %v351_v37 = vmul.f32 %v1038_v23, %v1273_v5 }
  0x16   : > { %v1042_v38 = vunpack.c.l.bf16 %v1096_v27  ;;  %v369_v40 = vadd.f32 %v1280_v10, %v346_v26  ;;  %v352_v41 = vmul.f32 %v1039_v34, %v1273_v5  ;;  %v1043_v42 = vunpack.c.h.bf16 %v1096_v27 }
  0x17   : > { %v382_v24 = vmax.f32 %v366_v18, 0.0  ;;  %v383_v25 = vmax.f32 %v367_v19, 0.0  ;;  %1131 = vmatpush3.bf16.msra.mxu0 %v1183_v16  ;;  %1166 = vmatpush3.bf16.msra.mxu1 %v1183_v16  ;;  %v1046_v43 = vunpack.c.l.bf16 %v1097_v30  ;;  %v370_v45 = vadd.f32 %v1280_v10, %v347_v29 }
  0x18   : > { %1132 = vmatprep.subr.bf16.mxu0 %v1184_v28  ;;  %v374_v46 = vadd.f32 %v1280_v10, %v351_v37  ;;  %v353_v47 = vmul.f32 %v1042_v38, %v1273_v5  ;;  %v1047_v48 = vunpack.c.h.bf16 %v1097_v30  ;;  %1159 = vmatprep.subr.bf16.mxu1 %v1184_v28  ;;  %v375_v49 = vadd.f32 %v1280_v10, %v352_v41 }
  0x19   : > { %v398_v31 = vpack.c.bf16 %v383_v25, %v382_v24  ;;  %v354_v50 = vmul.f32 %v1043_v42, %v1273_v5  ;;  %v355_v51 = vmul.f32 %v1046_v43, %v1273_v5  ;;  %v1050_v52 = vunpack.c.l.bf16 %v1098_v39  ;;  %v1352_v42 = vld [vmem:[%s1468_s4] ss:$0 sm:$0xff] }
  0x1a   : > { %v390_v53 = vmax.f32 %v374_v46, 0.0  ;;  %v376_v54 = vadd.f32 %v1280_v10, %v353_v47  ;;  %v356_v55 = vmul.f32 %v1047_v48, %v1273_v5  ;;  %v1051_v56 = vunpack.c.h.bf16 %v1098_v39 }
  0x1b   : > { %1138 = vmatprep.mubr.bf16.mxu0 %v398_v31  ;;  %1133 = vmatpush3.bf16.msra.mxu0 %v1184_v28  ;;  %v371_v57 = vadd.f32 %v1280_v10, %v348_v36  ;;  %v391_v58 = vmax.f32 %v375_v49, 0.0  ;;  %v377_v59 = vadd.f32 %v1280_v10, %v354_v50  ;;  %v378_v60 = vadd.f32 %v1280_v10, %v355_v51 }
  0x1c   : > { %1167 = vmatpush3.bf16.msra.mxu1 %v1184_v28  ;;  %1134 = vmatprep.subr.bf16.mxu0 %v1185_v44  ;;  %v349_v62 = vmul.f32 %v1034_v32, %v1273_v5  ;;  %v379_v63 = vadd.f32 %v1280_v10, %v356_v55  ;;  %v384_v0 = vmax.f32 %v368_v35, 0.0  ;;  %v385_v1 = vmax.f32 %v369_v40, 0.0 }
  0x1d   : > { %1160 = vmatprep.subr.bf16.mxu1 %v1185_v44  ;;  %v350_v2 = vmul.f32 %v1035_v33, %v1273_v5  ;;  %v402_v3 = vpack.c.bf16 %v391_v58, %v390_v53  ;;  %v392_v4 = vmax.f32 %v376_v54, 0.0  ;;  %v393_v6 = vmax.f32 %v377_v59, 0.0 }
  0x1e   : > { %v357_v7 = vmul.f32 %v1050_v52, %v1273_v5  ;;  %v358_v8 = vmul.f32 %v1051_v56, %v1273_v5  ;;  %v386_v9 = vmax.f32 %v370_v45, 0.0  ;;  %v387_v11 = vmax.f32 %v371_v57, 0.0 }
  0x1f   : > { %1135 = vmatpush3.bf16.msra.mxu0 %v1185_v44  ;;  %v394_v12 = vmax.f32 %v378_v60, 0.0  ;;  %v395_v13 = vmax.f32 %v379_v63, 0.0  ;;  %v372_v14 = vadd.f32 %v1280_v10, %v349_v62  ;;  %v373_v15 = vadd.f32 %v1280_v10, %v350_v2  ;;  %1146 = vmatprep.mubr.bf16.mxu1 %v402_v3 }
  0x20   : > { %1168 = vmatpush3.bf16.msra.mxu1 %v1185_v44  ;;  %1136 = vmatprep.subr.bf16.mxu0 %v1186_v61  ;;  %v399_v16 = vpack.c.bf16 %v385_v1, %v384_v0  ;;  %v403_v17 = vpack.c.bf16 %v393_v6, %v392_v4  ;;  %v380_v18 = vadd.f32 %v1280_v10, %v357_v7  ;;  %v670_v27 = vlaneseq }
  0x21   : > { %1161 = vmatprep.subr.bf16.mxu1 %v1186_v61  ;;  %v381_v19 = vadd.f32 %v1280_v10, %v358_v8  ;;  %v400_v5 = vpack.c.bf16 %v387_v11, %v386_v9  ;;  %v404_v20 = vpack.c.bf16 %v395_v13, %v394_v12  ;;  %v388_v21 = vmax.f32 %v372_v14, 0.0 }
  0x22   : > { %v389_v22 = vmax.f32 %v373_v15, 0.0  ;;  %v396_v23 = vmax.f32 %v380_v18, 0.0  ;;  %v1331_v28 = vshrl.u32 %v670_v27, 7  ;;  %v1336_v30 = vstv %s985_s8 }
  0x23   : > { %1137 = vmatpush3.bf16.msra.mxu0 %v1186_v61  ;;  %v397_v24 = vmax.f32 %v381_v19, 0.0  ;;  %v1195_v43 = vmov 0.0  }
  0x24   : > { %1169 = vmatpush3.bf16.msra.mxu1 %v1186_v61  ;;  %v401_v25 = vpack.c.bf16 %v389_v22, %v388_v21  ;;  %v673_v10 = vadd.s32 16, %v1331_v28  ;;  %v674_v29 = vadd.s32 24, %v1331_v28  ;;  %v672_v32 = vadd.s32 8, %v1331_v28 }
  0x25   : > { %v405_v26 = vpack.c.bf16 %v397_v24, %v396_v23  ;;  %v689_v34 = vadd.s32 %v1336_v30, %v1331_v28  ;;  %v677_v35 = vadd.s32 48, %v1331_v28  ;;  %v678_v36 = vadd.s32 56, %v1331_v28 }
  0x26   : > { %1139 = vmatmul.mubr.bf16.vlgmr.msra.gmra.mrb[0].mxu0 %v399_v16  ;;  %v691_v31 = vadd.s32 %v1336_v30, %v673_v10  ;;  %v692_v33 = vadd.s32 %v1336_v30, %v674_v29  ;;  %v690_v37 = vadd.s32 %v1336_v30, %v672_v32  ;;  %v675_v38 = vadd.s32 32, %v1331_v28 }
  0x27   : > { %1147 = vmatmul.mubr.bf16.vlgmr.msra.gmra.mrb[0].mxu1 %v403_v17  ;;  %1142 = vmatprep.mubr.bf16.mxu0 %v400_v5  ;;  %vm705_vm2 = vcmp.lt.s32.totalorder %v689_v34, 200  ;;  %v676_v39 = vadd.s32 40, %v1331_v28  ;;  %v695_v40 = vadd.s32 %v1336_v30, %v677_v35  ;;  %v696_v45 = vadd.s32 %v1336_v30, %v678_v36 }
  0x28   : > { %1150 = vmatprep.mubr.bf16.mxu1 %v404_v20  ;;  %vm707_vm0 = vcmp.lt.s32.totalorder %v691_v31, 200  ;;  %vm708_vm1 = vcmp.lt.s32.totalorder %v692_v33, 200  ;;  %vm706_vm3 = vcmp.lt.s32.totalorder %v690_v37, 200  ;;  %v986_v49 = vsel %vm705_vm2, 1.0, %v1195_v43 }
  0x29   : > { %v988_v44 = vsel %vm707_vm0, 1.0, %v1195_v43  ;;  %v989_v48 = vsel %vm708_vm1, 1.0, %v1195_v43  ;;  %v693_v53 = vadd.s32 %v1336_v30, %v675_v38  ;;  %v694_v54 = vadd.s32 %v1336_v30, %v676_v39 }
  0x2a   : > { %v681_v57 = vadd.s32 80, %v1331_v28  ;;  %vm711_vm4 = vcmp.lt.s32.totalorder %v695_v40, 200  ;;  %vm712_vm5 = vcmp.lt.s32.totalorder %v696_v45, 200  ;;  %v682_v4 = vadd.s32 88, %v1331_v28 }
  0x2b   : > { %v679_v6 = vadd.s32 64, %v1331_v28  ;;  %vm709_vm6 = vcmp.lt.s32.totalorder %v693_v53, 200  ;;  %v987_v13 = vsel %vm706_vm3, 1.0, %v1195_v43  ;;  %v1388_v14 = vsel %vm711_vm4, 1.0, %v1195_v43 }
  0x2c   : > { %v699_v8 = vadd.s32 %v1336_v30, %v681_v57  ;;  %v1395_v18 = vsel %vm712_vm5, 1.0, %v1195_v43  ;;  %vm710_vm7 = vcmp.lt.s32.totalorder %v694_v54, 200  ;;  %v990_v20 = vsel %vm709_vm6, 1.0, %v1195_v43 }
  0x2d   : > { %v1402_v21 = vadd.s32 %v1336_v30, %v682_v4  ;;  %v680_v22 = vadd.s32 72, %v1331_v28  ;;  %v697_v23 = vadd.s32 %v1336_v30, %v679_v6  ;;  %v684_v6 = vadd.s32 104, %v1331_v28 }
  0x2e   : > { %1143 = vmatmul.mubr.bf16.gmra.mrb[4].mxu0 %v401_v25  ;;  %vm715_vm8 = vcmp.lt.s32.totalorder %v699_v8, 200 }
  0x2f   : > { %1151 = vmatmul.mubr.bf16.gmra.mrb[4].mxu1 %v405_v26  ;;  %v996_v45 = vsel %vm715_vm8, 1.0, %v1195_v43  ;;  %vm716_vm9 = vcmp.lt.s32.totalorder %v1402_v21, 200  ;;  %vm713_vm10 = vcmp.lt.s32.totalorder %v697_v23, 200  ;;  %v702_v23 = vadd.s32 %v1336_v30, %v684_v6 }
  0x31   : > { %vm718_vm13 = vcmp.lt.s32.totalorder %v702_v23, 200 }
  0xf9   : > { %v1140_v41 = vpop.f32.mrb[0].mxu0 }
  0xfa   : > { %v1148_v46 = vpop.f32.mrb[0].mxu1  ;;  %v511_v47 = vpop.f32.mrb[1].mxu0  ;;  %v520_v58 = vadd.f32 %v1140_v41, %v1352_v42 }
  0xfb   : > { %v552_v50 = vadd.f32 %v1148_v46, %v1352_v42  ;;  %v543_v51 = vpop.f32.mrb[1].mxu1  ;;  %v1141_v52 = vpop.f32.mrb[2].mxu0  ;;  %v512_v63 = vadd.f32 %v1352_v42, %v511_v47  ;;  %v698_v46 = vadd.s32 %v1336_v30, %v680_v22  ;;  %v686_v22 = vadd.s32 120, %v1331_v28 }
  0xfc   : > { %v544_v55 = vadd.f32 %v1352_v42, %v543_v51  ;;  %v1149_v56 = vpop.f32.mrb[2].mxu1  ;;  %v523_v59 = vadd.f32 %v1141_v52, %v1352_v42  ;;  %v514_v60 = vpop.f32.mrb[3].mxu0 }
  0xfd   : > { %v555_v61 = vadd.f32 %v1149_v56, %v1352_v42  ;;  %v546_v62 = vpop.f32.mrb[3].mxu1  ;;  %v515_v0 = vadd.f32 %v1352_v42, %v514_v60  ;;  %vm714_vm11 = vcmp.lt.s32.totalorder %v698_v46, 200 }
  0xfe   : > { %v547_v1 = vadd.f32 %v1352_v42, %v546_v62  ;;  %v575_v2 = vpack.c.bf16 %v523_v59, %v520_v58 }
  0xff   : > { %v1376_v3 = vpack.c.bf16 %v555_v61, %v552_v50  ;;  %v574_v7 = vpack.c.bf16 %v515_v0, %v512_v63  ;;  %v683_v61 = vadd.s32 96, %v1331_v28 }
 0x100   : > { %v1381_v9 = vpack.c.bf16 %v547_v1, %v544_v55  ;;  %1099 = vst [vmem:[%s1372_s14 + $0x8] sm:$0xff] %v575_v2   ;;  %v656_v11 = vunpack.c.l.bf16 %v575_v2  ;;  %v657_v12 = vunpack.c.h.bf16 %v575_v2 }
 0x101   : > { %1103 = vst [vmem:[%s1372_s14 + $0x28] sm:$0xff] %v1376_v3   ;;  %1056 = vst [vmem:[%s1372_s14] sm:$0xff] %v574_v7   ;;  %v654_v15 = vunpack.c.l.bf16 %v574_v7  ;;  %v655_v16 = vunpack.c.h.bf16 %v574_v7  ;;  %v1144_v17 = vpop.f32.mrb[4].mxu0 }
 0x102   : > { %1102 = vst [vmem:[%s1372_s14 + $0x20] sm:$0xff] %v1381_v9   ;;  %v1152_v19 = vpop.f32.mrb[4].mxu1  ;;  %v527_v5 = vpop.f32.mrb[5].mxu0  ;;  %v755_v25 = vmul.f32 %v988_v44, %v656_v11  ;;  %v756_v31 = vmul.f32 %v989_v48, %v657_v12  ;;  %v536_v32 = vadd.f32 %v1144_v17, %v1352_v42  ;;  %v991_v44 = vsel %vm710_vm7, 1.0, %v1195_v43 }
 0x103   : > { %v559_v24 = vpop.f32.mrb[5].mxu1  ;;  %v753_v26 = vmul.f32 %v986_v49, %v654_v15  ;;  %v754_v27 = vmul.f32 %v987_v13, %v655_v16  ;;  %v1145_v10 = vpop.f32.mrb[6].mxu0  ;;  %v528_v33 = vadd.f32 %v1352_v42, %v527_v5  ;;  %v568_v53 = vadd.f32 %v1152_v19, %v1352_v42 }
 0x104   : > { %v1153_v29 = vpop.f32.mrb[6].mxu1  ;;  %v539_v34 = vadd.f32 %v1145_v10, %v1352_v42  ;;  %v530_v35 = vpop.f32.mrb[7].mxu0  ;;  %v792_v47 = vmul.f32 %v755_v25, %v755_v25  ;;  %v793_v51 = vmul.f32 %v756_v31, %v756_v31  ;;  %v560_v59 = vadd.f32 %v1352_v42, %v559_v24 }
 0x105   : > { %v562_v36 = vpop.f32.mrb[7].mxu1  ;;  %v769_v37 = vadd.f32 %v754_v27, %v753_v26  ;;  %v790_v38 = vmul.f32 %v753_v26, %v753_v26  ;;  %v791_v39 = vmul.f32 %v754_v27, %v754_v27  ;;  %v531_v40 = vadd.f32 %v1352_v42, %v530_v35 }
 0x106   : > { %v577_v41 = vpack.c.bf16 %v539_v34, %v536_v32  ;;  %v571_v60 = vadd.f32 %v1153_v29, %v1352_v42  ;;  %v563_v1 = vadd.f32 %v1352_v42, %v562_v36  ;;  %v662_v2 = vunpack.c.l.bf16 %v1381_v9 }
 0x107   : > { %v770_v48 = vadd.f32 %v769_v37, %v755_v25  ;;  %v806_v49 = vadd.f32 %v791_v39, %v790_v38  ;;  %v576_v50 = vpack.c.bf16 %v531_v40, %v528_v33  ;;  %v663_v13 = vunpack.c.h.bf16 %v1381_v9 }
 0x108   : > { %1101 = vst [vmem:[%s1372_s14 + $0x18] sm:$0xff] %v577_v41   ;;  %v660_v52 = vunpack.c.l.bf16 %v577_v41  ;;  %v661_v58 = vunpack.c.h.bf16 %v577_v41  ;;  %v1423_v4 = vpack.c.bf16 %v571_v60, %v568_v53  ;;  %v580_v12 = vpack.c.bf16 %v563_v1, %v560_v59 }
 0x109   : > { %v807_v55 = vadd.f32 %v806_v49, %v792_v47  ;;  %1100 = vst [vmem:[%s1372_s14 + $0x10] sm:$0xff] %v576_v50   ;;  %v658_v54 = vunpack.c.l.bf16 %v576_v50  ;;  %v659_v56 = vunpack.c.h.bf16 %v576_v50  ;;  %v771_v57 = vadd.f32 %v770_v48, %v756_v31 }
 0x10a   : > { %v759_v7 = vmul.f32 %v1388_v14, %v660_v52  ;;  %v994_v15 = vsel %vm713_vm10, 1.0, %v1195_v43  ;;  %1105 = vst [vmem:[%s1372_s14 + $0x38] sm:$0xff] %v1423_v4   ;;  %v685_v42 = vadd.s32 112, %v1331_v28  ;;  %v701_v16 = vadd.s32 %v1336_v30, %v683_v61  ;;  %1104 = vst [vmem:[%s1372_s14 + $0x30] sm:$0xff] %v580_v12  }
 0x10b   : > { %v757_v62 = vmul.f32 %v990_v20, %v658_v54  ;;  %v758_v63 = vmul.f32 %v991_v44, %v659_v56  ;;  %v808_v0 = vadd.f32 %v807_v55, %v793_v51  ;;  %v760_v17 = vmul.f32 %v1395_v18, %v661_v58 }
 0x10c   : > { %v664_v14 = vunpack.c.l.bf16 %v1376_v3  ;;  %v995_v9 = vsel %vm714_vm11, 1.0, %v1195_v43  ;;  %v796_v24 = vmul.f32 %v759_v7, %v759_v7  ;;  %v761_v27 = vmul.f32 %v994_v15, %v662_v2 }
 0x10d   : > { %v772_v8 = vadd.f32 %v771_v57, %v757_v62  ;;  %v794_v11 = vmul.f32 %v757_v62, %v757_v62  ;;  %v795_v5 = vmul.f32 %v758_v63, %v758_v63  ;;  %v665_v10 = vunpack.c.h.bf16 %v1376_v3 }
 0x10e   : > { %v997_v18 = vsel %vm716_vm9, 1.0, %v1195_v43  ;;  %v703_v29 = vadd.s32 %v1336_v30, %v685_v42  ;;  %vm717_vm12 = vcmp.lt.s32.totalorder %v701_v16, 200  ;;  %v797_v31 = vmul.f32 %v760_v17, %v760_v17 }
 0x10f   : > { %v773_v19 = vadd.f32 %v772_v8, %v758_v63  ;;  %v809_v20 = vadd.f32 %v808_v0, %v794_v11  ;;  %v762_v33 = vmul.f32 %v995_v9, %v663_v13  ;;  %v763_v28 = vmul.f32 %v996_v45, %v664_v14 }
 0x110   : > { %v704_v35 = vadd.s32 %v1336_v30, %v686_v22  ;;  %v798_v37 = vmul.f32 %v761_v27, %v761_v27  ;;  %v666_v39 = vunpack.c.l.bf16 %v580_v12  ;;  %v764_v3 = vmul.f32 %v997_v18, %v665_v10 }
 0x111   : > { %v774_v25 = vadd.f32 %v773_v19, %v759_v7  ;;  %v810_v26 = vadd.f32 %v809_v20, %v795_v5  ;;  %vm719_vm14 = vcmp.lt.s32.totalorder %v703_v29, 200  ;;  %v998_v21 = vsel %vm717_vm12, 1.0, %v1195_v43 }
 0x112   : > { %v799_v41 = vmul.f32 %v762_v33, %v762_v33  ;;  %v667_v46 = vunpack.c.h.bf16 %v580_v12  ;;  %v800_v47 = vmul.f32 %v763_v28, %v763_v28  ;;  %vm720_vm15 = vcmp.lt.s32.totalorder %v704_v35, 200 }
 0x113   : > { %v811_v32 = vadd.f32 %v810_v26, %v796_v24  ;;  %v775_v34 = vadd.f32 %v774_v25, %v760_v17  ;;  %v999_v48 = vsel %vm718_vm13, 1.0, %v1195_v43  ;;  %v668_v30 = vunpack.c.l.bf16 %v1423_v4 }
 0x114   : > { %v765_v50 = vmul.f32 %v998_v21, %v666_v39  ;;  %v801_v51 = vmul.f32 %v764_v3, %v764_v3  ;;  %v1000_v52 = vsel %vm719_vm14, 1.0, %v1195_v43  ;;  %v669_v55 = vunpack.c.h.bf16 %v1423_v4 }
 0x115   : > { %v776_v36 = vadd.f32 %v775_v34, %v761_v27  ;;  %v812_v38 = vadd.f32 %v811_v32, %v797_v31  ;;  %v766_v54 = vmul.f32 %v999_v48, %v667_v46  ;;  %v1001_v57 = vsel %vm720_vm15, 1.0, %v1195_v43 }
 0x116   : > { %v767_v58 = vmul.f32 %v1000_v52, %v668_v30  ;;  %v802_v60 = vmul.f32 %v765_v50, %v765_v50  ;;  %v768_v62 = vmul.f32 %v1001_v57, %v669_v55 }
 0x117   : > { %v777_v40 = vadd.f32 %v776_v36, %v762_v33  ;;  %v813_v44 = vadd.f32 %v812_v38, %v798_v37  ;;  %v803_v0 = vmul.f32 %v766_v54, %v766_v54 }
 0x118   : > { %v804_v2 = vmul.f32 %v767_v58, %v767_v58  ;;  %v805_v8 = vmul.f32 %v768_v62, %v768_v62 }
 0x119   : > { %v778_v45 = vadd.f32 %v777_v40, %v763_v28  ;;  %v814_v49 = vadd.f32 %v813_v44, %v799_v41 }
 0x11b   : > { %v815_v53 = vadd.f32 %v814_v49, %v800_v47  ;;  %v779_v56 = vadd.f32 %v778_v45, %v764_v3 }
 0x11d   : > { %v780_v59 = vadd.f32 %v779_v56, %v765_v50  ;;  %v816_v61 = vadd.f32 %v815_v53, %v801_v51 }
 0x11f   : > { %v781_v63 = vadd.f32 %v780_v59, %v766_v54  ;;  %v817_v1 = vadd.f32 %v816_v61, %v802_v60 }
 0x121   : > { %v782_v6 = vadd.f32 %v781_v63, %v767_v58  ;;  %v818_v7 = vadd.f32 %v817_v1, %v803_v0 }
 0x123   : > { %v783_v4 = vadd.f32 %v782_v6, %v768_v62  ;;  %v819_v11 = vadd.f32 %v818_v7, %v804_v2 }
 0x125   : > { %v784_v12 = vrot.slane %v783_v4, 4  ;;  %v820_v13 = vadd.f32 %v819_v11, %v805_v8 }
 0x127   : > { %v785_v43 = vadd.f32 %v784_v12, %v783_v4  ;;  %v821_v15 = vrot.slane %v820_v13, 4 }
 0x129   : > { %v786_v42 = vrot.slane %v785_v43, 2  ;;  %v822_v16 = vadd.f32 %v821_v15, %v820_v13 }
 0x12b   : > { %v787_v17 = vadd.f32 %v786_v42, %v785_v43  ;;  %v823_v19 = vrot.slane %v822_v16, 2 }
 0x12d   : > { %v788_v5 = vrot.slane %v787_v17, 1  ;;  %v824_v20 = vadd.f32 %v823_v19, %v822_v16 }
 0x12f   : > { %v789_v14 = vadd.f32 %v788_v5, %v787_v17  ;;  %v825_v9 = vrot.slane %v824_v20, 1 }
 0x131   : > { %v826_v22 = vadd.f32 %v825_v9, %v824_v20  ;;  %827 = vst [vmem:[%s298_s16] sm:$0xff] %v789_v14 }
 0x133   : > { %828 = vst [vmem:[%s302_s19] sm:$0xff] %v826_v22 }
 0x134 PF: > { %s18_s24 = sadd.s32 1, %s1193_s24  }
 0x135   : > { %p15_p5 = scmp.ge.s32.totalorder %s18_s24, 4  }
 0x137   :  { %17 = sbr.rel (!%p15_p5) target bundleno = 1 (0x1), region = 94 }

</bundles_post_ra>
